<compile_context>
chip_gen: v6e
topology: v6e:2x2x1
jax: 0.10.0
libtpu: 0.0.40
codegen_flags: <defaults>
</compile_context>

<pallas_src>
import jax
import jax.numpy as jnp
from jax.experimental import pallas as pl
from jax.experimental.pallas import tpu as pltpu

NEG_SLOPE = 0.01      # nn.LeakyReLU() default
LANE_PAD = 128        # lane-dense width for the logits slab


def _round_up(n, m):
    return ((n + m - 1) // m) * m


def _pick_d_tile(D, d_tile):
    """Largest multiple of 128 that divides D and is <= d_tile (else full D)."""
    if D <= d_tile or D % 128 != 0:
        return D
    dk = (min(d_tile, D) // 128) * 128
    while dk >= 128:
        if D % dk == 0:
            return dk
        dk -= 128
    return D


def _head_kernel(x_ref, s_ref,
                 w1, b1, w2, b2, w3, b3, w4, b4, w5, b5, w6, b6,
                 o_ref, acc_ref):
    """Grid = (batch tiles [parallel], D chunks [arbitrary, reduction]).

    x_ref : (tb, dk) input chunk in natural layout.
    s_ref : (dk, G)  bf16 avg-pool/select matrix chunk (1/8 at rows %8==7).
    w*/b* : resident bf16 weights (in, out) / f32 biases (1, out).
    o_ref : (tb, LANE_PAD) f32 lane-dense logits slab.
    acc_ref: (tb, G) f32 pooled-feature accumulator (VMEM scratch).
    """
    j = pl.program_id(1)

    @pl.when(j == 0)
    def _():
        acc_ref[...] = jnp.zeros_like(acc_ref)

    # ---- MaxPool1d(8): in-lane sliding-max tree (XLU rolls + VPU max) ----
    t = x_ref[...]                                   # (tb, dk) f32
    t = jnp.maximum(t, pltpu.roll(t, 1, axis=1))     # max over [i-1, i]
    t = jnp.maximum(t, pltpu.roll(t, 2, axis=1))     # max over [i-3, i]
    t = jnp.maximum(t, pltpu.roll(t, 4, axis=1))     # max over [i-7, i]

    # ---- AvgPool1d(8) + group gather: one small bf16 MXU matmul ----------
    # Only lanes i % 8 == 7 of `t` carry weight 1/8 in s_ref, so the circular
    # wraparound of the rolls (lanes 0..6 of the chunk) is never consumed.
    acc_ref[...] += jnp.dot(t.astype(jnp.bfloat16), s_ref[...],
                            preferred_element_type=jnp.float32)

    # ---- 6 x (Linear -> LeakyReLU) on the last D chunk --------------------
    @pl.when(j == pl.num_programs(1) - 1)
    def _():
        h = acc_ref[...]                             # (tb, G) f32
        for w_ref, b_ref in ((w1, b1), (w2, b2), (w3, b3),
                             (w4, b4), (w5, b5), (w6, b6)):
            z = jnp.dot(h.astype(jnp.bfloat16), w_ref[...],
                        preferred_element_type=jnp.float32)
            z = z + b_ref[...]
            h = jnp.where(z > 0, z, NEG_SLOPE * z)   # LeakyReLU (also after fc6)
        o_ref[...] = h.astype(o_ref.dtype)


def prepare_params(params, *, weights_dtype=jnp.bfloat16):
    """params: [(w, b), ...] with w already transposed to (in, out).

    Returns (select_matrix, layers):
      select_matrix: (D, G) bf16, folds AvgPool1d(8) + group gather
                     (1/8 at rows 64*g + 8*m + 7, column g).
      layers:        bf16 weights / f32 biases; last layer zero-padded to a
                     lane-dense LANE_PAD output width.
    """
    G = params[0][0].shape[0]
    D = 64 * G
    rows = jnp.arange(D)
    sel = ((rows % 8) == 7)[:, None] & ((rows // 64)[:, None] == jnp.arange(G)[None, :])
    s_mat = jnp.where(sel, 0.125, 0.0).astype(weights_dtype)          # (D, G)

    layers = []
    last = len(params) - 1
    for idx, (w, b) in enumerate(params):
        w = jnp.asarray(w)
        b = jnp.asarray(b).reshape(1, -1)
        if idx == last:
            pad = _round_up(w.shape[1], LANE_PAD) - w.shape[1]
            w = jnp.pad(w, ((0, 0), (0, pad)))
            b = jnp.pad(b, ((0, 0), (0, pad)))
        layers.append((w.astype(weights_dtype), b.astype(jnp.float32)))
    return s_mat, layers


def classification_head1(x, prepared, *, num_classes=None,
                         batch_tile=512, d_tile=1280):
    """x: (B, input_dim) f32 (bf16 also accepted).  prepared = prepare_params(...)."""
    s_mat, layers = prepared
    B, D = x.shape
    assert D % 64 == 0, "input_dim must be divisible by 64 (MaxPool(8)+AvgPool(8))"
    assert s_mat.shape[0] == D, "fc1 in_features must equal input_dim // 64"
    G = s_mat.shape[1]
    out_padded = layers[-1][0].shape[1]
    if num_classes is None:
        num_classes = out_padded

    # Batch tile: multiple of 8, capped by (padded) batch; keep >=2 batch tiles
    # so the "parallel" axis can shard across both v7x TensorCores.
    tb = min(max(_round_up(batch_tile, 8), 8), _round_up(B, 8))
    if _round_up(B, tb) == tb and tb > 8:
        tb = max(8, _round_up(pl.cdiv(B, 2), 8))
    B_pad = _round_up(B, tb)
    if B_pad != B:
        x = jnp.pad(x, ((0, B_pad - B), (0, 0)))     # zero rows, sliced off below

    dk = _pick_d_tile(D, d_tile)
    grid = (B_pad // tb, D // dk)

    in_specs = [pl.BlockSpec((tb, dk), lambda i, j: (i, j)),     # x chunk
                pl.BlockSpec((dk, G), lambda i, j: (j, 0))]      # select chunk
    args = [x, s_mat]
    for w, b in layers:
        args += [w, b]
        in_specs += [pl.BlockSpec(w.shape, lambda i, j: (0, 0)),  # resident weight
                     pl.BlockSpec(b.shape, lambda i, j: (0, 0))]  # resident bias

    out = pl.pallas_call(
        _head_kernel,
        out_shape=jax.ShapeDtypeStruct((B_pad, out_padded), jnp.float32),
        grid=grid,
        in_specs=in_specs,
        out_specs=pl.BlockSpec((tb, out_padded), lambda i, j: (i, 0)),
        scratch_shapes=[pltpu.VMEM((tb, G), jnp.float32)],
        compiler_params=pltpu.CompilerParams(
            dimension_semantics=("parallel", "arbitrary"),
            vmem_limit_bytes=48 * 1024 * 1024),
    )(*args)

    return out[:B, :num_classes]


def init_params(key, input_dim=5120, num_classes=3):
    """PyTorch-style Linear init; weights returned already transposed to (in, out)."""
    dims = [input_dim // 64, 1024, 256, 64, 16, 4, num_classes]
    params = []
    for i in range(len(dims) - 1):
        key, kw, kb = jax.random.split(key, 3)
        fan_in, fan_out = dims[i], dims[i + 1]
        bound = 1.0 / jnp.sqrt(fan_in)
        w = jax.random.uniform(kw, (fan_in, fan_out), jnp.float32, -bound, bound)
        b = jax.random.uniform(kb, (1, fan_out), jnp.float32, -bound, bound)
        params.append((w, b))
    return params


def reference(x, params, neg_slope=NEG_SLOPE):
    """Pure-f32 forward matching the PyTorch module."""
    B, D = x.shape
    h = x.reshape(B, D // 8, 8).max(axis=-1)        # MaxPool1d(8)
    h = h.reshape(B, D // 64, 8).mean(axis=-1)      # AvgPool1d(8)
    for w, b in params:
        h = h @ w + b.reshape(1, -1)
        h = jnp.where(h > 0, h, neg_slope * h)      # LeakyReLU (incl. last layer)
    return h


def reference_bf16(x, params, neg_slope=NEG_SLOPE):
    """Reference mirroring the kernel's bf16 operand storage (f32 accumulation)."""
    bf = lambda a: a.astype(jnp.bfloat16).astype(jnp.float32)
    B, D = x.shape
    h = bf(x).reshape(B, D // 8, 8).max(axis=-1)
    h = h.reshape(B, D // 64, 8).mean(axis=-1)
    for w, b in params:
        h = bf(h) @ bf(w) + b.reshape(1, -1)
        h = jnp.where(h > 0, h, neg_slope * h)
    return h


if __name__ == "__main__":
    key = jax.random.PRNGKey(0)
    key, kx = jax.random.split(key)

    INPUT_DIM = 5120      # module default -> 5120 // 64 = 80 pooled features
    NUM_CLASSES = 3
    BATCH = 20            # small demo batch; not tile-aligned -> exercises padding

    params = init_params(key, INPUT_DIM, NUM_CLASSES)            # f32, (in, out) weights
    x = jax.random.normal(kx, (BATCH, INPUT_DIM), jnp.float32)

    prepared = prepare_params(params)                             # bf16 weights + select matrix
    # batch_tile=16 only so the tiny demo batch runs >1 grid step on both axes;
    # production default is batch_tile=512, d_tile=1280.
    out = classification_head1(x, prepared, num_classes=NUM_CLASSES,
                               batch_tile=16, d_tile=1280)
    out = jax.block_until_ready(out)
    assert out.shape == (BATCH, NUM_CLASSES)

    # Tolerance absorbs MXU precision-mode differences (Mosaic bf16 matmuls vs
    # XLA) on top of the bf16 operand-storage drift already mirrored here.
    ref = reference_bf16(x, params)
    err = float(jnp.max(jnp.abs(out - ref)))
    assert jnp.allclose(out, ref, atol=2e-2, rtol=2e-2), f"mismatch vs reference: {err}"

    print("KERNEL_OK")
</pallas_src>

<mosaic_0001>
module attributes {stable_mosaic.version = 11 : i64} {
  func.func @_head_kernel(%arg0: i32, %arg1: i32, %arg2: memref<16x1280xf32, #tpu.memory_space<vmem>>, %arg3: memref<1280x80xbf16, #tpu.memory_space<vmem>>, %arg4: memref<80x1024xbf16, #tpu.memory_space<vmem>>, %arg5: memref<1x1024xf32, #tpu.memory_space<vmem>>, %arg6: memref<1024x256xbf16, #tpu.memory_space<vmem>>, %arg7: memref<1x256xf32, #tpu.memory_space<vmem>>, %arg8: memref<256x64xbf16, #tpu.memory_space<vmem>>, %arg9: memref<1x64xf32, #tpu.memory_space<vmem>>, %arg10: memref<64x16xbf16, #tpu.memory_space<vmem>>, %arg11: memref<1x16xf32, #tpu.memory_space<vmem>>, %arg12: memref<16x4xbf16, #tpu.memory_space<vmem>>, %arg13: memref<1x4xf32, #tpu.memory_space<vmem>>, %arg14: memref<4x128xbf16, #tpu.memory_space<vmem>>, %arg15: memref<1x128xf32, #tpu.memory_space<vmem>>, %arg16: memref<16x128xf32, #tpu.memory_space<vmem>>, %arg17: memref<16x80xf32, #tpu.memory_space<vmem>>) attributes {dimension_semantics = [#tpu.dimension_semantics<parallel>, #tpu.dimension_semantics<arbitrary>], iteration_bounds = array<i64: 2, 4>, scalar_prefetch = 0 : i64, scratch_operands = 1 : i64, tpu.core_type = #tpu.core_type<tc>, window_params = [{transform_indices = @transform_0, window_bounds = array<i64: 16, 1280>}, {transform_indices = @transform_1, window_bounds = array<i64: 1280, 80>}, {pipeline_mode = #tpu.pipeline_mode<synchronous>, transform_indices = @transform_2, window_bounds = array<i64: 80, 1024>}, {pipeline_mode = #tpu.pipeline_mode<synchronous>, transform_indices = @transform_3, window_bounds = array<i64: 1, 1024>}, {pipeline_mode = #tpu.pipeline_mode<synchronous>, transform_indices = @transform_4, window_bounds = array<i64: 1024, 256>}, {pipeline_mode = #tpu.pipeline_mode<synchronous>, transform_indices = @transform_5, window_bounds = array<i64: 1, 256>}, {pipeline_mode = #tpu.pipeline_mode<synchronous>, transform_indices = @transform_6, window_bounds = array<i64: 256, 64>}, {pipeline_mode = #tpu.pipeline_mode<synchronous>, transform_indices = @transform_7, window_bounds = array<i64: 1, 64>}, {pipeline_mode = #tpu.pipeline_mode<synchronous>, transform_indices = @transform_8, window_bounds = array<i64: 64, 16>}, {pipeline_mode = #tpu.pipeline_mode<synchronous>, transform_indices = @transform_9, window_bounds = array<i64: 1, 16>}, {pipeline_mode = #tpu.pipeline_mode<synchronous>, transform_indices = @transform_10, window_bounds = array<i64: 16, 4>}, {pipeline_mode = #tpu.pipeline_mode<synchronous>, transform_indices = @transform_11, window_bounds = array<i64: 1, 4>}, {pipeline_mode = #tpu.pipeline_mode<synchronous>, transform_indices = @transform_12, window_bounds = array<i64: 4, 128>}, {pipeline_mode = #tpu.pipeline_mode<synchronous>, transform_indices = @transform_13, window_bounds = array<i64: 1, 128>}, {transform_indices = @transform_14, window_bounds = array<i64: 16, 128>}]} {
    %c0_i32 = arith.constant 0 : i32
    %0 = arith.cmpi eq, %arg1, %c0_i32 : i32
    %1 = arith.extui %0 : i1 to i32
    %c0_i32_0 = arith.constant 0 : i32
    %2 = arith.cmpi ne, %1, %c0_i32_0 : i32
    scf.if %2 {
      %cst_9 = arith.constant 0.000000e+00 : f32
      %19 = vector.broadcast %cst_9 : f32 to vector<16x80xf32>
      %c0_10 = arith.constant 0 : index
      %c0_11 = arith.constant 0 : index
      %20 = vector.load %arg17[%c0_10, %c0_11] : memref<16x80xf32, #tpu.memory_space<vmem>>, vector<16x80xf32>
      tpu.vector_store %arg17[%c0_10, %c0_11], %19 {strides = array<i32>} : memref<16x80xf32, #tpu.memory_space<vmem>>, vector<16x80xf32>,
    } else {
    }
    %c0 = arith.constant 0 : index
    %c0_1 = arith.constant 0 : index
    %3 = vector.load %arg2[%c0, %c0_1] : memref<16x1280xf32, #tpu.memory_space<vmem>>, vector<16x1280xf32>
    %c1_i32 = arith.constant 1 : i32
    %4 = tpu.dynamic_rotate %3 by %c1_i32 dim 1 : vector<16x1280xf32>, i32 -> vector<16x1280xf32>
    %5 = arith.maximumf %3, %4 : vector<16x1280xf32>
    %c2_i32 = arith.constant 2 : i32
    %6 = tpu.dynamic_rotate %5 by %c2_i32 dim 1 : vector<16x1280xf32>, i32 -> vector<16x1280xf32>
    %7 = arith.maximumf %5, %6 : vector<16x1280xf32>
    %c4_i32 = arith.constant 4 : i32
    %8 = tpu.dynamic_rotate %7 by %c4_i32 dim 1 : vector<16x1280xf32>, i32 -> vector<16x1280xf32>
    %9 = arith.maximumf %7, %8 : vector<16x1280xf32>
    %c0_2 = arith.constant 0 : index
    %c0_3 = arith.constant 0 : index
    %10 = vector.load %arg17[%c0_2, %c0_3] : memref<16x80xf32, #tpu.memory_space<vmem>>, vector<16x80xf32>
    %11 = arith.truncf %9 : vector<16x1280xf32> to vector<16x1280xbf16>
    %c0_4 = arith.constant 0 : index
    %c0_5 = arith.constant 0 : index
    %12 = vector.load %arg3[%c0_4, %c0_5] : memref<1280x80xbf16, #tpu.memory_space<vmem>>, vector<1280x80xbf16>
    %cst = arith.constant dense<0.000000e+00> : vector<16x80xf32>
    %13 = tpu.matmul %11, %12, %cst {dimension_numbers = #tpu.dot_dimension_numbers<[1], [0], [0], [1], [0, 0, 1, 1], [], []>} : vector<16x1280xbf16>, vector<1280x80xbf16>, vector<16x80xf32> -> vector<16x80xf32>
    %14 = arith.addf %10, %13 : vector<16x80xf32>
    %c0_6 = arith.constant 0 : index
    %c0_7 = arith.constant 0 : index
    %15 = vector.load %arg17[%c0_6, %c0_7] : memref<16x80xf32, #tpu.memory_space<vmem>>, vector<16x80xf32>
    tpu.vector_store %arg17[%c0_6, %c0_7], %14 {strides = array<i32>} : memref<16x80xf32, #tpu.memory_space<vmem>>, vector<16x80xf32>,
    %c3_i32 = arith.constant 3 : i32
    %16 = arith.cmpi eq, %arg1, %c3_i32 : i32
    %17 = arith.extui %16 : i1 to i32
    %c0_i32_8 = arith.constant 0 : i32
    %18 = arith.cmpi ne, %17, %c0_i32_8 : i32
    scf.if %18 {
      %c0_9 = arith.constant 0 : index
      %c0_10 = arith.constant 0 : index
      %19 = vector.load %arg17[%c0_9, %c0_10] : memref<16x80xf32, #tpu.memory_space<vmem>>, vector<16x80xf32>
      %20 = arith.truncf %19 : vector<16x80xf32> to vector<16x80xbf16>
      %c0_11 = arith.constant 0 : index
      %c0_12 = arith.constant 0 : index
      %21 = vector.load %arg4[%c0_11, %c0_12] : memref<80x1024xbf16, #tpu.memory_space<vmem>>, vector<80x1024xbf16>
      %cst_13 = arith.constant dense<0.000000e+00> : vector<16x1024xf32>
      %22 = tpu.matmul %20, %21, %cst_13 {dimension_numbers = #tpu.dot_dimension_numbers<[1], [0], [0], [1], [0, 0, 1, 1], [], []>} : vector<16x80xbf16>, vector<80x1024xbf16>, vector<16x1024xf32> -> vector<16x1024xf32>
      %c0_14 = arith.constant 0 : index
      %c0_15 = arith.constant 0 : index
      %23 = vector.load %arg5[%c0_14, %c0_15] : memref<1x1024xf32, #tpu.memory_space<vmem>>, vector<1x1024xf32>
      %24 = vector.broadcast %23 : vector<1x1024xf32> to vector<16x1024xf32>
      %25 = arith.addf %22, %24 : vector<16x1024xf32>
      %cst_16 = arith.constant 0.000000e+00 : f32
      %26 = vector.broadcast %cst_16 : f32 to vector<16x1024xf32>
      %27 = arith.cmpf ogt, %25, %26 : vector<16x1024xf32>
      %cst_17 = arith.constant 0.00999999977 : f32
      %28 = vector.broadcast %cst_17 : f32 to vector<16x1024xf32>
      %29 = arith.mulf %28, %25 : vector<16x1024xf32>
      %30 = arith.select %27, %25, %29 : vector<16x1024xi1>, vector<16x1024xf32>
      %31 = arith.truncf %30 : vector<16x1024xf32> to vector<16x1024xbf16>
      %c0_18 = arith.constant 0 : index
      %c0_19 = arith.constant 0 : index
      %32 = vector.load %arg6[%c0_18, %c0_19] : memref<1024x256xbf16, #tpu.memory_space<vmem>>, vector<1024x256xbf16>
      %cst_20 = arith.constant dense<0.000000e+00> : vector<16x256xf32>
      %33 = tpu.matmul %31, %32, %cst_20 {dimension_numbers = #tpu.dot_dimension_numbers<[1], [0], [0], [1], [0, 0, 1, 1], [], []>} : vector<16x1024xbf16>, vector<1024x256xbf16>, vector<16x256xf32> -> vector<16x256xf32>
      %c0_21 = arith.constant 0 : index
      %c0_22 = arith.constant 0 : index
      %34 = vector.load %arg7[%c0_21, %c0_22] : memref<1x256xf32, #tpu.memory_space<vmem>>, vector<1x256xf32>
      %35 = vector.broadcast %34 : vector<1x256xf32> to vector<16x256xf32>
      %36 = arith.addf %33, %35 : vector<16x256xf32>
      %cst_23 = arith.constant 0.000000e+00 : f32
      %37 = vector.broadcast %cst_23 : f32 to vector<16x256xf32>
      %38 = arith.cmpf ogt, %36, %37 : vector<16x256xf32>
      %cst_24 = arith.constant 0.00999999977 : f32
      %39 = vector.broadcast %cst_24 : f32 to vector<16x256xf32>
      %40 = arith.mulf %39, %36 : vector<16x256xf32>
      %41 = arith.select %38, %36, %40 : vector<16x256xi1>, vector<16x256xf32>
      %42 = arith.truncf %41 : vector<16x256xf32> to vector<16x256xbf16>
      %c0_25 = arith.constant 0 : index
      %c0_26 = arith.constant 0 : index
      %43 = vector.load %arg8[%c0_25, %c0_26] : memref<256x64xbf16, #tpu.memory_space<vmem>>, vector<256x64xbf16>
      %cst_27 = arith.constant dense<0.000000e+00> : vector<16x64xf32>
      %44 = tpu.matmul %42, %43, %cst_27 {dimension_numbers = #tpu.dot_dimension_numbers<[1], [0], [0], [1], [0, 0, 1, 1], [], []>} : vector<16x256xbf16>, vector<256x64xbf16>, vector<16x64xf32> -> vector<16x64xf32>
      %c0_28 = arith.constant 0 : index
      %c0_29 = arith.constant 0 : index
      %45 = vector.load %arg9[%c0_28, %c0_29] : memref<1x64xf32, #tpu.memory_space<vmem>>, vector<1x64xf32>
      %46 = vector.broadcast %45 : vector<1x64xf32> to vector<16x64xf32>
      %47 = arith.addf %44, %46 : vector<16x64xf32>
      %cst_30 = arith.constant 0.000000e+00 : f32
      %48 = vector.broadcast %cst_30 : f32 to vector<16x64xf32>
      %49 = arith.cmpf ogt, %47, %48 : vector<16x64xf32>
      %cst_31 = arith.constant 0.00999999977 : f32
      %50 = vector.broadcast %cst_31 : f32 to vector<16x64xf32>
      %51 = arith.mulf %50, %47 : vector<16x64xf32>
      %52 = arith.select %49, %47, %51 : vector<16x64xi1>, vector<16x64xf32>
      %53 = arith.truncf %52 : vector<16x64xf32> to vector<16x64xbf16>
      %c0_32 = arith.constant 0 : index
      %c0_33 = arith.constant 0 : index
      %54 = vector.load %arg10[%c0_32, %c0_33] : memref<64x16xbf16, #tpu.memory_space<vmem>>, vector<64x16xbf16>
      %cst_34 = arith.constant dense<0.000000e+00> : vector<16x16xf32>
      %55 = tpu.matmul %53, %54, %cst_34 {dimension_numbers = #tpu.dot_dimension_numbers<[1], [0], [0], [1], [0, 0, 1, 1], [], []>} : vector<16x64xbf16>, vector<64x16xbf16>, vector<16x16xf32> -> vector<16x16xf32>
      %c0_35 = arith.constant 0 : index
      %c0_36 = arith.constant 0 : index
      %56 = vector.load %arg11[%c0_35, %c0_36] : memref<1x16xf32, #tpu.memory_space<vmem>>, vector<1x16xf32>
      %57 = vector.broadcast %56 : vector<1x16xf32> to vector<16x16xf32>
      %58 = arith.addf %55, %57 : vector<16x16xf32>
      %cst_37 = arith.constant 0.000000e+00 : f32
      %59 = vector.broadcast %cst_37 : f32 to vector<16x16xf32>
      %60 = arith.cmpf ogt, %58, %59 : vector<16x16xf32>
      %cst_38 = arith.constant 0.00999999977 : f32
      %61 = vector.broadcast %cst_38 : f32 to vector<16x16xf32>
      %62 = arith.mulf %61, %58 : vector<16x16xf32>
      %63 = arith.select %60, %58, %62 : vector<16x16xi1>, vector<16x16xf32>
      %64 = arith.truncf %63 : vector<16x16xf32> to vector<16x16xbf16>
      %c0_39 = arith.constant 0 : index
      %c0_40 = arith.constant 0 : index
      %65 = vector.load %arg12[%c0_39, %c0_40] : memref<16x4xbf16, #tpu.memory_space<vmem>>, vector<16x4xbf16>
      %cst_41 = arith.constant dense<0.000000e+00> : vector<16x4xf32>
      %66 = tpu.matmul %64, %65, %cst_41 {dimension_numbers = #tpu.dot_dimension_numbers<[1], [0], [0], [1], [0, 0, 1, 1], [], []>} : vector<16x16xbf16>, vector<16x4xbf16>, vector<16x4xf32> -> vector<16x4xf32>
      %c0_42 = arith.constant 0 : index
      %c0_43 = arith.constant 0 : index
      %67 = vector.load %arg13[%c0_42, %c0_43] : memref<1x4xf32, #tpu.memory_space<vmem>>, vector<1x4xf32>
      %68 = vector.broadcast %67 : vector<1x4xf32> to vector<16x4xf32>
      %69 = arith.addf %66, %68 : vector<16x4xf32>
      %cst_44 = arith.constant 0.000000e+00 : f32
      %70 = vector.broadcast %cst_44 : f32 to vector<16x4xf32>
      %71 = arith.cmpf ogt, %69, %70 : vector<16x4xf32>
      %cst_45 = arith.constant 0.00999999977 : f32
      %72 = vector.broadcast %cst_45 : f32 to vector<16x4xf32>
      %73 = arith.mulf %72, %69 : vector<16x4xf32>
      %74 = arith.select %71, %69, %73 : vector<16x4xi1>, vector<16x4xf32>
      %75 = arith.truncf %74 : vector<16x4xf32> to vector<16x4xbf16>
      %c0_46 = arith.constant 0 : index
      %c0_47 = arith.constant 0 : index
      %76 = vector.load %arg14[%c0_46, %c0_47] : memref<4x128xbf16, #tpu.memory_space<vmem>>, vector<4x128xbf16>
      %cst_48 = arith.constant dense<0.000000e+00> : vector<16x128xf32>
      %77 = tpu.matmul %75, %76, %cst_48 {dimension_numbers = #tpu.dot_dimension_numbers<[1], [0], [0], [1], [0, 0, 1, 1], [], []>} : vector<16x4xbf16>, vector<4x128xbf16>, vector<16x128xf32> -> vector<16x128xf32>
      %c0_49 = arith.constant 0 : index
      %c0_50 = arith.constant 0 : index
      %78 = vector.load %arg15[%c0_49, %c0_50] : memref<1x128xf32, #tpu.memory_space<vmem>>, vector<1x128xf32>
      %79 = vector.broadcast %78 : vector<1x128xf32> to vector<16x128xf32>
      %80 = arith.addf %77, %79 : vector<16x128xf32>
      %cst_51 = arith.constant 0.000000e+00 : f32
      %81 = vector.broadcast %cst_51 : f32 to vector<16x128xf32>
      %82 = arith.cmpf ogt, %80, %81 : vector<16x128xf32>
      %cst_52 = arith.constant 0.00999999977 : f32
      %83 = vector.broadcast %cst_52 : f32 to vector<16x128xf32>
      %84 = arith.mulf %83, %80 : vector<16x128xf32>
      %85 = arith.select %82, %80, %84 : vector<16x128xi1>, vector<16x128xf32>
      %c0_53 = arith.constant 0 : index
      %c0_54 = arith.constant 0 : index
      %86 = vector.load %arg16[%c0_53, %c0_54] : memref<16x128xf32, #tpu.memory_space<vmem>>, vector<16x128xf32>
      tpu.vector_store %arg16[%c0_53, %c0_54], %85 {strides = array<i32>} : memref<16x128xf32, #tpu.memory_space<vmem>>, vector<16x128xf32>,
    } else {
    }
    return
  }
  func.func @transform_0(%arg0: i32, %arg1: i32) -> (i32, i32) {
    %c0_i32 = arith.constant 0 : i32
    return %arg0, %arg1 : i32, i32
  }
  func.func @transform_1(%arg0: i32, %arg1: i32) -> (i32, i32) {
    %c0_i32 = arith.constant 0 : i32
    %c0_i32_0 = arith.constant 0 : i32
    return %arg1, %c0_i32 : i32, i32
  }
  func.func @transform_2(%arg0: i32, %arg1: i32) -> (i32, i32) {
    %c0_i32 = arith.constant 0 : i32
    %c0_i32_0 = arith.constant 0 : i32
    %c0_i32_1 = arith.constant 0 : i32
    return %c0_i32, %c0_i32_0 : i32, i32
  }
  func.func @transform_3(%arg0: i32, %arg1: i32) -> (i32, i32) {
    %c0_i32 = arith.constant 0 : i32
    %c0_i32_0 = arith.constant 0 : i32
    %c0_i32_1 = arith.constant 0 : i32
    return %c0_i32, %c0_i32_0 : i32, i32
  }
  func.func @transform_4(%arg0: i32, %arg1: i32) -> (i32, i32) {
    %c0_i32 = arith.constant 0 : i32
    %c0_i32_0 = arith.constant 0 : i32
    %c0_i32_1 = arith.constant 0 : i32
    return %c0_i32, %c0_i32_0 : i32, i32
  }
  func.func @transform_5(%arg0: i32, %arg1: i32) -> (i32, i32) {
    %c0_i32 = arith.constant 0 : i32
    %c0_i32_0 = arith.constant 0 : i32
    %c0_i32_1 = arith.constant 0 : i32
    return %c0_i32, %c0_i32_0 : i32, i32
  }
  func.func @transform_6(%arg0: i32, %arg1: i32) -> (i32, i32) {
    %c0_i32 = arith.constant 0 : i32
    %c0_i32_0 = arith.constant 0 : i32
    %c0_i32_1 = arith.constant 0 : i32
    return %c0_i32, %c0_i32_0 : i32, i32
  }
  func.func @transform_7(%arg0: i32, %arg1: i32) -> (i32, i32) {
    %c0_i32 = arith.constant 0 : i32
    %c0_i32_0 = arith.constant 0 : i32
    %c0_i32_1 = arith.constant 0 : i32
    return %c0_i32, %c0_i32_0 : i32, i32
  }
  func.func @transform_8(%arg0: i32, %arg1: i32) -> (i32, i32) {
    %c0_i32 = arith.constant 0 : i32
    %c0_i32_0 = arith.constant 0 : i32
    %c0_i32_1 = arith.constant 0 : i32
    return %c0_i32, %c0_i32_0 : i32, i32
  }
  func.func @transform_9(%arg0: i32, %arg1: i32) -> (i32, i32) {
    %c0_i32 = arith.constant 0 : i32
    %c0_i32_0 = arith.constant 0 : i32
    %c0_i32_1 = arith.constant 0 : i32
    return %c0_i32, %c0_i32_0 : i32, i32
  }
  func.func @transform_10(%arg0: i32, %arg1: i32) -> (i32, i32) {
    %c0_i32 = arith.constant 0 : i32
    %c0_i32_0 = arith.constant 0 : i32
    %c0_i32_1 = arith.constant 0 : i32
    return %c0_i32, %c0_i32_0 : i32, i32
  }
  func.func @transform_11(%arg0: i32, %arg1: i32) -> (i32, i32) {
    %c0_i32 = arith.constant 0 : i32
    %c0_i32_0 = arith.constant 0 : i32
    %c0_i32_1 = arith.constant 0 : i32
    return %c0_i32, %c0_i32_0 : i32, i32
  }
  func.func @transform_12(%arg0: i32, %arg1: i32) -> (i32, i32) {
    %c0_i32 = arith.constant 0 : i32
    %c0_i32_0 = arith.constant 0 : i32
    %c0_i32_1 = arith.constant 0 : i32
    return %c0_i32, %c0_i32_0 : i32, i32
  }
  func.func @transform_13(%arg0: i32, %arg1: i32) -> (i32, i32) {
    %c0_i32 = arith.constant 0 : i32
    %c0_i32_0 = arith.constant 0 : i32
    %c0_i32_1 = arith.constant 0 : i32
    return %c0_i32, %c0_i32_0 : i32, i32
  }
  func.func @transform_14(%arg0: i32, %arg1: i32) -> (i32, i32) {
    %c0_i32 = arith.constant 0 : i32
    %c0_i32_0 = arith.constant 0 : i32
    return %arg0, %c0_i32 : i32, i32
  }
}

</mosaic_0001>

<bundles_post_ra>
// kernel: tpu_custom_call.1
= control target key start
LH: loop header
LB: loop body
LE: loop exit
PB: predicated region body
PF: predicated region fallthrough
CT: control target
= control target key end

     0   :  { %s6349_s0 = inlined_call_operand.vmem [shape: f32[32,5120], index: 0, kind: input, shape index: {}]   ;;  %s6350_s1 = inlined_call_operand.vmem [shape: bf16[5120,80], index: 1, kind: input, shape index: {}]   ;;  %s6351_s2 = inlined_call_operand.vmem [shape: bf16[80,1024], index: 2, kind: input, shape index: {}]   ;;  %s6352_s3 = inlined_call_operand.vmem [shape: f32[1,1024], index: 3, kind: input, shape index: {}]   ;;  %s6353_s4 = inlined_call_operand.vmem [shape: bf16[1024,256], index: 4, kind: input, shape index: {}]   ;;  %s6354_s5 = inlined_call_operand.vmem [shape: f32[1,256], index: 5, kind: input, shape index: {}]   ;;  %s6355_s6 = inlined_call_operand.vmem [shape: bf16[256,64], index: 6, kind: input, shape index: {}]   ;;  %s6356_s7 = inlined_call_operand.vmem [shape: f32[1,64], index: 7, kind: input, shape index: {}]   ;;  %s6357_s8 = inlined_call_operand.vmem [shape: bf16[64,16], index: 8, kind: input, shape index: {}]   ;;  %s6358_s9 = inlined_call_operand.vmem [shape: f32[1,16], index: 9, kind: input, shape index: {}]   ;;  %s6359_s10 = inlined_call_operand.vmem [shape: bf16[16,4], index: 10, kind: input, shape index: {}]   ;;  %s6360_s11 = inlined_call_operand.vmem [shape: f32[1,4], index: 11, kind: input, shape index: {}]   ;;  %s6361_s12 = inlined_call_operand.vmem [shape: bf16[4,128], index: 12, kind: input, shape index: {}]   ;;  %s6362_s13 = inlined_call_operand.vmem [shape: f32[1,128], index: 13, kind: input, shape index: {}]   ;;  %s6363_s14 = inlined_call_operand.hbm [shape: f32[32,128], index: 14, kind: output, shape index: {}]  }
   0x1   :  { %6369 = sst [smem:[#allocation12_spill]] %s6349_s0 }
   0x2   :  { %6370 = sst [smem:[#allocation13_spill]] %s6358_s9 }
   0x3   :  { %6371 = sst [smem:[#allocation14_spill]] %s6360_s11 }
   0x4   :  { %6372 = sst [smem:[#allocation15_spill]] %s6361_s12 }
   0x5   :  { %6373 = sst [smem:[#allocation16_spill]] %s6362_s13 }
   0x6   :  { %6374 = sst [smem:[#allocation17_spill]] %s6363_s14 }
   0x7   :  { %19 = vsyncpa [#allocation5], 0 }
   0x8   :  { %21 = vsyncpa [#allocation5 + $0x1], 0  ;;  %s4901_s29 = smov 0   ;;  %s4903_s30 = smov 0  }
   0x9   :  { %s4905_s15 = smov 0   ;;  %s4907_s16 = smov 0  }
   0xa   :  { %s4909_s17 = smov 0   ;;  %s4911_s18 = smov 0  }
   0xb   :  { %s4913_s19 = smov 0   ;;  %s4915_s20 = smov 0  }
   0xc   :  { %s4917_s21 = smov 0   ;;  %s4919_s22 = smov 0  }
   0xd LB: > { %6375 = sst [smem:[#allocation7_spill]] %s4778_s29  ;;  %s3701_s23 = sadd.s32 4294967295, %s4814_s22   ;;  %s4814_s22 = sphi %s4919_s22, %s27_s22   ;;  %s4810_s21 = sphi %s4917_s21, %s6403_s21   ;;  %s4806_s20 = sphi %s4915_s20, %s6402_s20   ;;  %s4802_s19 = sphi %s4913_s19, %s6401_s19   ;;  %s4798_s18 = sphi %s4911_s18, %s6400_s18   ;;  %s4794_s17 = sphi %s4909_s17, %s6399_s17   ;;  %s4790_s16 = sphi %s4907_s16, %s6398_s16   ;;  %s4786_s15 = sphi %s4905_s15, %s6397_s15   ;;  %s4782_s30 = sphi %s4903_s30, %s6396_s30   ;;  %s4778_s29 = sphi %s4901_s29, %s6395_s29  }
   0xe   : > { %6376 = sst [smem:[#allocation8_spill]] %s4802_s19  ;;  %s3702_s24 = sadd.s32 4294967294, %s4814_s22  }
   0xf   : > { %s36_s25 = sadd.s32 1, %s4806_s20  ;;  %s39_s26 = sadd.s32 1, %s4810_s21 }
  0x10   : > { %p37_p0 = scmp.ge.s32.totalorder %s36_s25, 4  ;;  %s48_s27 = sadd.s32 1, %s4794_s17 }
  0x11   : > { %p55_p1 = scmp.ne.s32.totalorder %s4794_s17, %s4790_s16  ;;  %p56_p2 = scmp.eq.s32.totalorder %s4814_s22, 0 }
  0x12   : > { %s6405_s25 = smov (%p37_p0, %s36_s25), 0  ;;  %s6407_s26 = smov (!%p37_p0, %s39_s26), %s4810_s21 }
  0x13   : > { %6377 = sst [smem:[#allocation9_spill]] %s6405_s25  ;;  %s44_s28 = ssub.s32 %s4806_s20, %s6405_s25 }
  0x14   : > { %p4964_p3 = por %p56_p2, %p55_p1  ;;  %p41_p4 = scmp.ge.s32.totalorder %s6407_s26, 2 }
  0x15   : > { %s352_s19 = sadd.s32 1, %s4786_s15  ;;  %p362_p5 = scmp.ne.s32.totalorder %s4786_s15, %s4782_s30 }
  0x16   : > { %p363_p6 = scmp.eq.s32.totalorder %s3701_s23, 7  ;;  %s6409_s26 = smov (%p41_p4, %s6407_s26), 0 }
  0x17   : > { %6379 = sst [smem:[#allocation10_spill]] %s6409_s26  ;;  %p368_p8 = scmp.ne.s32.totalorder %s4782_s30, %s4778_s29 }
  0x18   : > { %p4973_p7 = por %p363_p6, %p362_p5  ;;  %s43_s11 = ssub.s32 %s4810_s21, %s6409_s26 }
  0x19   : > { %p369_p9 = scmp.eq.s32.totalorder %s3702_s24, 7  ;;  %s45_s25 = sor.u32 %s44_s28, %s43_s11 }
  0x1a   : > { %p350_p10 = scmp.eq.s32.totalorder %s43_s11, 0  ;;  %p46_p11 = scmp.eq.s32.totalorder %s45_s25, 0 }
  0x1b   : > { %p4981_p12 = por %p369_p9, %p368_p8  ;;  %p3704_p13 = scmp.ge.s32.totalorder %s4814_s22, 8 }
  0x1c   : > { %s4986_s9 = scalar_select %p350_p10, %s4786_s15, %s352_s19  }
  0x1d   : > { %s6381_s12 = scalar_select %p4981_p12, 1, 0 }
  0x1e   : > { %s4989_s23 = scalar_select %p46_p11, %s4794_s17, %s48_s27  }
  0x1f   : > { %6382 = sst [smem:[#allocation11_spill]] %s6381_s12  ;;  %421 = sbr.rel (%p3704_p13) target bundleno = 55 (0x37), region = 64 }
  0x24   : > { %424 = sbr.rel (!%p4964_p3) target bundleno = 55 (0x37), region = 68  ;;  %s426_s24 = sand.u32 (%p4964_p3), 1, %s4794_s17  }
  0x25   : > { %s430_s11 = smul.u32 (%p4964_p3), 10, %s4806_s20  ;;  %s6383_s0 = sld [smem:[#allocation12_spill]] (%p4964_p3) }
  0x26   : > { %s4164_s25 = smul.u32 (%p4964_p3), 160, %s426_s24 }
  0x27   : > { %s4165_s28 = smul.u32 (%p4964_p3), 80, %s4810_s21 }
  0x28   : > { %s5005_s14 = scalar_lea.vmem (%p4964_p3), [#allocation3], %s4164_s25 }
  0x29   : > { %s432_s26 = sadd.s32 %s4165_s28, %s430_s11 }
  0x2a   : > { %s3707_s29 = sshll.u32 %s432_s26, 3 }
  0x2b   : > { %s5000_s27 = scalar_lea.vmem %s6383_s0, %s3707_s29 }
  0x2c   : > { %v447_v0 = vld [vmem:[%s5000_s27] sm:$0xff]  ;;  %v449_v1 = vld [vmem:[%s5000_s27 + $0x8] sm:$0xff]  ;;  %v451_v2 = vld [vmem:[%s5000_s27 + $0x10] sm:$0xff] }
  0x2d   : > { %448 = vst [vmem:[%s5005_s14] sm:$0xff] %v447_v0  ;;  %450 = vst [vmem:[%s5005_s14 + $0x8] sm:$0xff] %v449_v1  ;;  %v453_v3 = vld [vmem:[%s5000_s27 + $0x18] sm:$0xff]  ;;  %v455_v4 = vld [vmem:[%s5000_s27 + $0x20] sm:$0xff] }
  0x2e   : > { %452 = vst [vmem:[%s5005_s14 + $0x10] sm:$0xff] %v451_v2  ;;  %v457_v5 = vld [vmem:[%s5000_s27 + $0x28] sm:$0xff]  ;;  %454 = vst [vmem:[%s5005_s14 + $0x18] sm:$0xff] %v453_v3  ;;  %v459_v6 = vld [vmem:[%s5000_s27 + $0x30] sm:$0xff] }
  0x2f   : > { %456 = vst [vmem:[%s5005_s14 + $0x20] sm:$0xff] %v455_v4  ;;  %458 = vst [vmem:[%s5005_s14 + $0x28] sm:$0xff] %v457_v5  ;;  %v461_v7 = vld [vmem:[%s5000_s27 + $0x38] sm:$0xff]  ;;  %v463_v8 = vld [vmem:[%s5000_s27 + $0x40] sm:$0xff] }
  0x30   : > { %460 = vst [vmem:[%s5005_s14 + $0x30] sm:$0xff] %v459_v6  ;;  %462 = vst [vmem:[%s5005_s14 + $0x38] sm:$0xff] %v461_v7  ;;  %v465_v9 = vld [vmem:[%s5000_s27 + $0x48] sm:$0xff]  ;;  %v467_v10 = vld [vmem:[%s5000_s27 + $0x140] sm:$0xff] }
  0x31   : > { %464 = vst [vmem:[%s5005_s14 + $0x40] sm:$0xff] %v463_v8  ;;  %v469_v11 = vld [vmem:[%s5000_s27 + $0x148] sm:$0xff]  ;;  %466 = vst [vmem:[%s5005_s14 + $0x48] sm:$0xff] %v465_v9  ;;  %v471_v12 = vld [vmem:[%s5000_s27 + $0x150] sm:$0xff] }
  0x32   : > { %468 = vst [vmem:[%s5005_s14 + $0x50] sm:$0xff] %v467_v10  ;;  %470 = vst [vmem:[%s5005_s14 + $0x58] sm:$0xff] %v469_v11  ;;  %v473_v13 = vld [vmem:[%s5000_s27 + $0x158] sm:$0xff]  ;;  %v475_v14 = vld [vmem:[%s5000_s27 + $0x160] sm:$0xff] }
  0x33   : > { %472 = vst [vmem:[%s5005_s14 + $0x60] sm:$0xff] %v471_v12  ;;  %474 = vst [vmem:[%s5005_s14 + $0x68] sm:$0xff] %v473_v13  ;;  %v477_v15 = vld [vmem:[%s5000_s27 + $0x168] sm:$0xff]  ;;  %v479_v16 = vld [vmem:[%s5000_s27 + $0x170] sm:$0xff] }
  0x34   : > { %476 = vst [vmem:[%s5005_s14 + $0x70] sm:$0xff] %v475_v14  ;;  %v481_v17 = vld [vmem:[%s5000_s27 + $0x178] sm:$0xff]  ;;  %478 = vst [vmem:[%s5005_s14 + $0x78] sm:$0xff] %v477_v15  ;;  %v483_v18 = vld [vmem:[%s5000_s27 + $0x180] sm:$0xff] }
  0x35   : > { %480 = vst [vmem:[%s5005_s14 + $0x80] sm:$0xff] %v479_v16  ;;  %482 = vst [vmem:[%s5005_s14 + $0x88] sm:$0xff] %v481_v17  ;;  %v485_v19 = vld [vmem:[%s5000_s27 + $0x188] sm:$0xff] }
  0x36   : > { %484 = vst [vmem:[%s5005_s14 + $0x90] sm:$0xff] %v483_v18  ;;  %486 = vst [vmem:[%s5005_s14 + $0x98] sm:$0xff] %v485_v19 }
  0x37 PF: > { %p3708_p0 = scmp.ge.s32.totalorder %s4814_s22, 1  ;;  %p500_p1 = scmp.lt.s32.totalorder %s4814_s22, 9 }
  0x39   : > { %p501_p2 = pnand %p3708_p0, %p500_p1 }
  0x3a   : > { %s507_s12 = sand.u32 (!%p501_p2), 1, %s4790_s16   ;;  %s554_s29 = sand.u32 (!%p501_p2), 1, %s4782_s30  }
  0x3b   : > { %504 = sbr.rel (%p501_p2) target bundleno = 2073 (0x819), region = 95  ;;  %s3709_s24 = sshll.u32 (!%p501_p2), %s554_s29, 4 }
  0x3c   : > { %s4166_s26 = smul.u32 (!%p501_p2), 160, %s507_s12  ;;  %s5058_s0 = scalar_lea.vmem (!%p501_p2), [#allocation4], %s3709_s24 }
  0x3d   : > { %s559_s11 = smul.u32 (!%p501_p2), 160, %s4798_s18  ;;  %p3711_p4 = scmp.ne.s32.totalorder (!%p501_p2), %s4798_s18, 0 }
  0x3e   : > { %s5056_s14 = scalar_lea.vmem (!%p501_p2), [#allocation3], %s4166_s26 }
  0x3f   : > { %p560_p3 = scmp.lt.s32.totalorder (!%p501_p2), %s559_s11, 639 }
  0x40   : > { %570 = sbr.rel (%p3711_p4) target bundleno = 71 (0x47), region = 103 }
  0x41   : > { %s6411_s11 = smov (!%p560_p3, %s559_s11), 639 }
  0x42   : > { %s3710_s25 = sshll.u32 %s6411_s11, 2 }
  0x43   : > { %s5054_s27 = scalar_lea.vmem %s6350_s1, %s3710_s25 }
  0x45   : > { %vm571_vm0 = vcmask 654336   ;;  %v4816_v20 = vmov 0.0  }
  0x46   : > { %572 = vst.msk [vmem:[#allocation2] sm:$0xff] %vm571_vm0, %v4816_v20  ;;  %573 = vst.msk [vmem:[#allocation2 + $0x8] sm:$0xff] %vm571_vm0, %v4816_v20 }
  0x47 PF: > { %v5062_v21 = vld [vmem:[%s5056_s14 + $0x40] sm:$0xff]  ;;  %v5065_v22 = vld [vmem:[%s5056_s14 + $0x90] sm:$0xff]  ;;  %v5072_v26 = vld [vmem:[%s5056_s14 + $0x48] sm:$0xff]  ;;  %s4817_s16 = smov 1   ;;  %v634_v51 = vlaneseq  ;;  %s4818_s12 = smov 2   ;;  %vm1698_vm4 = vcmask 654336  }
  0x48   : > { %v574_v23 = vld [vmem:[%s5056_s14] sm:$0xff]  ;;  %v4273_v24 = vpack.i.bf16 %v5065_v22, %v5062_v21  ;;  %v584_v25 = vld [vmem:[%s5056_s14 + $0x50] sm:$0xff]  ;;  %v5075_v27 = vld [vmem:[%s5056_s14 + $0x98] sm:$0xff]  ;;  %s4819_s26 = smov 4   ;;  %p3792_p5 = scmp.ne.s32.totalorder %s4798_s18, 3 }
  0x49   : > { %v4263_v28 = vpack.i.bf16 %v584_v25, %v574_v23  ;;  %v575_v29 = vld [vmem:[%s5056_s14 + $0x8] sm:$0xff]  ;;  %v585_v30 = vld [vmem:[%s5056_s14 + $0x58] sm:$0xff]  ;;  %v4278_v31 = vpack.i.bf16 %v5075_v27, %v5072_v26  ;;  %v5082_v33 = vld [vmem:[%s5056_s14 + $0x10] sm:$0xff]  ;;  %v5130_v53 = vand.u32 127, %v634_v51  ;;  %s6384_s11 = sld [smem:[#allocation13_spill]] (!%p3792_p5) }
  0x4a   : > { %4274 = vrot.lane.b32.xlu1 %v4273_v24, %s4817_s16  ;;  %v4268_v32 = vpack.i.bf16 %v585_v30, %v575_v29  ;;  %v5085_v34 = vld [vmem:[%s5056_s14 + $0x60] sm:$0xff]  ;;  %v5088_v35 = vld [vmem:[%s5056_s14 + $0x38] sm:$0xff]  ;;  %v5091_v36 = vld [vmem:[%s5056_s14 + $0x88] sm:$0xff]  ;;  %s6385_s19 = sld [smem:[#allocation15_spill]] (!%p3792_p5) }
  0x4b   : > { %4264 = vrot.lane.b32.xlu0 %v4263_v28, %s4817_s16  ;;  %v5094_v37 = vld [vmem:[%s5056_s14 + $0x20] sm:$0xff]  ;;  %v5097_v38 = vld [vmem:[%s5056_s14 + $0x70] sm:$0xff]  ;;  %v4288_v39 = vpack.i.bf16 %v5085_v34, %v5082_v33  ;;  %v5102_v40 = vld [vmem:[%s5056_s14 + $0x18] sm:$0xff]  ;;  %v4283_v42 = vpack.i.bf16 %v5091_v36, %v5088_v35  ;;  %vm636_vm1 = vcmp.lt.s32.totalorder %v5130_v53, 1  ;;  %vm717_vm2 = vcmp.lt.s32.totalorder %v5130_v53, 2 }
  0x4c   : > { %v5105_v41 = vld [vmem:[%s5056_s14 + $0x68] sm:$0xff]  ;;  %v5110_v43 = vld [vmem:[%s5056_s14 + $0x30] sm:$0xff]  ;;  %v5113_v44 = vld [vmem:[%s5056_s14 + $0x80] sm:$0xff]  ;;  %v4298_v45 = vpack.i.bf16 %v5097_v38, %v5094_v37  ;;  %vm798_vm3 = vcmp.lt.s32.totalorder %v5130_v53, 4 }
  0x4d   : > { %v5118_v46 = vld [vmem:[%s5056_s14 + $0x28] sm:$0xff]  ;;  %v5121_v47 = vld [vmem:[%s5056_s14 + $0x78] sm:$0xff]  ;;  %v4293_v48 = vpack.i.bf16 %v5105_v41, %v5102_v40  ;;  %v4308_v49 = vpack.i.bf16 %v5113_v44, %v5110_v43 }
  0x4e   : > { %4279 = vrot.lane.b32.xlu1 %v4278_v31, %s4817_s16  ;;  %v4303_v50 = vpack.i.bf16 %v5121_v47, %v5118_v46 }
  0x4f   : > { %4269 = vrot.lane.b32.xlu0 %v4268_v32, %s4817_s16 }
  0x52   : > { %4289 = vrot.lane.b32.xlu1 %v4288_v39, %s4817_s16 }
  0x53   : > { %4284 = vrot.lane.b32.xlu0 %v4283_v42, %s4817_s16 }
  0x56   : > { %4299 = vrot.lane.b32.xlu1 %v4298_v45, %s4817_s16 }
  0x57   : > { %4294 = vrot.lane.b32.xlu0 %v4293_v48, %s4817_s16 }
  0x5a   : > { %4309 = vrot.lane.b32.xlu1 %v4308_v49, %s4817_s16 }
  0x5b   : > { %4304 = vrot.lane.b32.xlu0 %v4303_v50, %s4817_s16  ;;  %s6386_s16 = sld [smem:[#allocation14_spill]] (!%p3792_p5) }
  0xbc   : > { %v4275_v52 = vpop.permute.xlu1 %4274 }
  0xbd   : > { %v4265_v54 = vpop.permute.xlu0 %4264  ;;  %v4277_v58 = vunpack.i.h.bf16 %v4275_v52  ;;  %v4276_v59 = vunpack.i.l.bf16 %v4275_v52 }
  0xbe   : > { %v4267_v55 = vunpack.i.h.bf16 %v4265_v54  ;;  %v4266_v56 = vunpack.i.l.bf16 %v4265_v54 }
  0xc0   : > { %v4280_v57 = vpop.permute.xlu1 %4279 }
  0xc1   : > { %v4282_v60 = vunpack.i.h.bf16 %v4280_v57  ;;  %v4281_v61 = vunpack.i.l.bf16 %v4280_v57  ;;  %v4270_v62 = vpop.permute.xlu0 %4269 }
  0xc2   : > { %v4272_v63 = vunpack.i.h.bf16 %v4270_v62  ;;  %v4271_v0 = vunpack.i.l.bf16 %v4270_v62 }
  0xc3   : > { %v637_v1 = vsel %vm636_vm1, %v4276_v59, %v4281_v61  ;;  %v638_v2 = vsel %vm636_vm1, %v4277_v58, %v4282_v60  ;;  %v655_v3 = vsel %vm636_vm1, %v4281_v61, %v4266_v56  ;;  %v656_v4 = vsel %vm636_vm1, %v4282_v60, %v4267_v55 }
  0xc4   : > { %v653_v5 = vsel %vm636_vm1, %v4266_v56, %v4271_v0  ;;  %v654_v6 = vsel %vm636_vm1, %v4267_v55, %v4272_v63  ;;  %v4290_v7 = vpop.permute.xlu1 %4289  ;;  %v5145_v8 = vmax.f32 %v574_v23, %v655_v3  ;;  %v5147_v9 = vmax.f32 %v584_v25, %v656_v4 }
  0xc5   : > { %v4292_v10 = vunpack.i.h.bf16 %v4290_v7  ;;  %v4291_v11 = vunpack.i.l.bf16 %v4290_v7  ;;  %v4285_v12 = vpop.permute.xlu0 %4284  ;;  %v5149_v13 = vmax.f32 %v575_v29, %v653_v5  ;;  %v5151_v14 = vmax.f32 %v585_v30, %v654_v6 }
  0xc6   : > { %v4287_v15 = vunpack.i.h.bf16 %v4285_v12  ;;  %v4286_v16 = vunpack.i.l.bf16 %v4285_v12  ;;  %v4313_v17 = vpack.i.bf16 %v5147_v9, %v5145_v8  ;;  %v5156_v18 = vmax.f32 %v5072_v26, %v637_v1  ;;  %v4415_v12 = vld [vmem:[%s5054_s27 + $0x70] sm:$0xff]  }
  0xc7   : > { %v651_v19 = vsel %vm636_vm1, %v4271_v0, %v4291_v11  ;;  %v652_v20 = vsel %vm636_vm1, %v4272_v63, %v4292_v10  ;;  %v4318_v23 = vpack.i.bf16 %v5151_v14, %v5149_v13  ;;  %v5165_v24 = vmax.f32 %v5075_v27, %v638_v2 }
  0xc8   : > { %v640_v25 = vsel %vm636_vm1, %v4287_v15, %v4277_v58  ;;  %v639_v28 = vsel %vm636_vm1, %v4286_v16, %v4276_v59  ;;  %v4300_v26 = vpop.permute.xlu1 %4299  ;;  %4314 = vrot.lane.b32.xlu0 %v4313_v17, %s4818_s12  ;;  %v5173_v29 = vmax.f32 %v5082_v33, %v651_v19  ;;  %v5176_v30 = vmax.f32 %v5085_v34, %v652_v20  ;;  %v4416_v17 = vld [vmem:[%s5054_s27 + $0x30] sm:$0xff]   ;;  %v4419_v19 = vld [vmem:[%s5054_s27 + $0x68] sm:$0xff]  }
  0xc9   : > { %v4302_v31 = vunpack.i.h.bf16 %v4300_v26  ;;  %v4301_v32 = vunpack.i.l.bf16 %v4300_v26  ;;  %v4295_v27 = vpop.permute.xlu0 %4294  ;;  %4319 = vrot.lane.b32.xlu1 %v4318_v23, %s4818_s12  ;;  %v5180_v39 = vmax.f32 %v5062_v21, %v639_v28  ;;  %v4323_v48 = vpack.i.bf16 %v5165_v24, %v5156_v18  ;;  %v4422_v20 = vld [vmem:[%s5054_s27 + $0xb0] sm:$0xff]   ;;  %v4425_v23 = vld [vmem:[%s5054_s27 + $0xe8] sm:$0xff]   ;;  %v4423_v28 = vld [vmem:[%s5054_s27 + $0x60] sm:$0xff]  }
  0xca   : > { %v4297_v42 = vunpack.i.h.bf16 %v4295_v27  ;;  %v4296_v45 = vunpack.i.l.bf16 %v4295_v27  ;;  %v5185_v49 = vmax.f32 %v5065_v22, %v640_v25  ;;  %v4333_v33 = vpack.i.bf16 %v5176_v30, %v5173_v29  ;;  %v4420_v25 = vld [vmem:[%s5054_s27 + $0x28] sm:$0xff]   ;;  %v4427_v27 = vld [vmem:[%s5054_s27 + $0x58] sm:$0xff]  }
  0xcb   : > { %v4426_v26 = vld [vmem:[%s5054_s27 + $0xa8] sm:$0xff]  }
  0xcc   : > { %v648_v34 = vsel %vm636_vm1, %v4297_v42, %v4302_v31  ;;  %v650_v50 = vsel %vm636_vm1, %v4292_v10, %v4297_v42  ;;  %v647_v21 = vsel %vm636_vm1, %v4296_v45, %v4301_v32  ;;  %v649_v52 = vsel %vm636_vm1, %v4291_v11, %v4296_v45  ;;  %v4310_v54 = vpop.permute.xlu1 %4309  ;;  %4324 = vrot.lane.b32.xlu0 %v4323_v48, %s4818_s12  ;;  %v4414_v11 = vld [vmem:[%s5054_s27 + $0x38] sm:$0xff]   ;;  %v4430_v45 = vld [vmem:[%s5054_s27 + $0xa0] sm:$0xff]   ;;  %v4431_v48 = vld [vmem:[%s5054_s27 + $0x50] sm:$0xff]  }
  0xcd   : > { %v4312_v22 = vunpack.i.h.bf16 %v4310_v54  ;;  %v4311_v55 = vunpack.i.l.bf16 %v4310_v54  ;;  %v4305_v56 = vpop.permute.xlu0 %4304  ;;  %v4328_v57 = vpack.i.bf16 %v5185_v49, %v5180_v39  ;;  %v5201_v58 = vmax.f32 %v5102_v40, %v649_v52  ;;  %v4428_v42 = vld [vmem:[%s5054_s27 + $0x18] sm:$0xff]   ;;  %v4436_v52 = vld [vmem:[%s5054_s27 + $0x8] sm:$0xff]  }
  0xce   : > { %v4307_v59 = vunpack.i.h.bf16 %v4305_v56  ;;  %v4306_v60 = vunpack.i.l.bf16 %v4305_v56  ;;  %v5204_v61 = vmax.f32 %v5105_v41, %v650_v50  ;;  %v5207_v62 = vmax.f32 %v5094_v37, %v647_v21  ;;  %v4434_v50 = vld [vmem:[%s5054_s27 + $0x98] sm:$0xff]   ;;  %v4435_v21 = vld [vmem:[%s5054_s27 + $0x48] sm:$0xff]  }
  0xcf   : > { %4329 = vrot.lane.b32.xlu1 %v4328_v57, %s4818_s12  ;;  %v5211_v63 = vmax.f32 %v5097_v38, %v648_v34  ;;  %v641_v4 = vsel %vm636_vm1, %v4311_v55, %v4286_v16  ;;  %v642_v5 = vsel %vm636_vm1, %v4312_v22, %v4287_v15  ;;  %v4417_v15 = vld [vmem:[%s5054_s27 + $0xf8] sm:$0xff]  }
  0xd0   : > { %v644_v0 = vsel %vm636_vm1, %v4307_v59, %v4312_v22  ;;  %v646_v40 = vsel %vm636_vm1, %v4302_v31, %v4307_v59  ;;  %v643_v1 = vsel %vm636_vm1, %v4306_v60, %v4311_v55  ;;  %v645_v41 = vsel %vm636_vm1, %v4301_v32, %v4306_v60  ;;  %4334 = vrot.lane.b32.xlu0 %v4333_v33, %s4818_s12  ;;  %v4418_v16 = vld [vmem:[%s5054_s27 + $0xb8] sm:$0xff]   ;;  %v4429_v31 = vld [vmem:[%s5054_s27 + $0xe0] sm:$0xff]   ;;  %v4432_v33 = vld [vmem:[%s5054_s27 + $0x10] sm:$0xff]  }
  0xd1   : > { %v4338_v37 = vpack.i.bf16 %v5204_v61, %v5201_v58  ;;  %v4343_v38 = vpack.i.bf16 %v5211_v63, %v5207_v62  ;;  %v5227_v2 = vmax.f32 %v5118_v46, %v645_v41  ;;  %v5230_v3 = vmax.f32 %v5121_v47, %v646_v40  ;;  %4021 = vmatprep.subr.bf16.mxu1 %v4417_v15  ;;  %v4424_v32 = vld [vmem:[%s5054_s27 + $0x20] sm:$0xff]   ;;  %v4433_v34 = vld [vmem:[%s5054_s27 + $0xd8] sm:$0xff]   ;;  %v4437_v22 = vld [vmem:[%s5054_s27 + $0xd0] sm:$0xff]  }
  0xd2   : > { %v5237_v6 = vmax.f32 %v5110_v43, %v643_v1  ;;  %v5240_v7 = vmax.f32 %v5113_v44, %v644_v0  ;;  %v5249_v10 = vmax.f32 %v5088_v35, %v641_v4  ;;  %v5252_v43 = vmax.f32 %v5091_v36, %v642_v5  ;;  %v4413_v44 = vld [vmem:[%s5054_s27 + $0x78] sm:$0xff]   ;;  %v4421_v36 = vld [vmem:[%s5054_s27 + $0xf0] sm:$0xff]   ;;  %4022 = vmatpush3.bf16.msra.mxu1 %v4418_v16 }
  0xd3   : > { %4339 = vrot.lane.b32.xlu1 %v4338_v37, %s4818_s12  ;;  %v4348_v46 = vpack.i.bf16 %v5230_v3, %v5227_v2  ;;  %3999 = vmatprep.subr.bf16.mxu0 %v4413_v44  ;;  %v4438_v5 = vld [vmem:[%s5054_s27 + $0x90] sm:$0xff]   ;;  %v4441_v44 = vld [vmem:[%s5054_s27 + $0xc8] sm:$0xff]  }
  0xd4   : > { %4344 = vrot.lane.b32.xlu0 %v4343_v38, %s4818_s12  ;;  %v4353_v47 = vpack.i.bf16 %v5240_v7, %v5237_v6  ;;  %v4358_v35 = vpack.i.bf16 %v5252_v43, %v5249_v10  ;;  %4000 = vmatpush3.bf16.msra.mxu0 %v4414_v11 }
  0xd5   : > { %4001 = vmatprep.subr.bf16.mxu0 %v4415_v12  ;;  %4023 = vmatprep.subr.bf16.mxu1 %v4421_v36 }
  0xd6   : > { %4024 = vmatpush3.bf16.msra.mxu1 %v4422_v20 }
  0xd7   : > { %4349 = vrot.lane.b32.xlu1 %v4348_v46, %s4818_s12  ;;  %4025 = vmatprep.subr.bf16.mxu1 %v4425_v23  ;;  %v4439_v46 = vld [vmem:[%s5054_s27 + $0x40] sm:$0xff]   ;;  %v4442_v23 = vld [vmem:[%s5054_s27 + $0x88] sm:$0xff]  }
  0xd8   : > { %4354 = vrot.lane.b32.xlu0 %v4353_v47, %s4818_s12  ;;  %4002 = vmatpush3.bf16.msra.mxu0 %v4416_v17  ;;  %v4440_v47 = vld [vmem:[%s5054_s27] sm:$0xff]  }
  0xd9   : > { %4003 = vmatprep.subr.bf16.mxu0 %v4419_v19 }
  0xda   : > { %4026 = vmatpush3.bf16.msra.mxu1 %v4426_v26  ;;  %v4444_v26 = vld [vmem:[%s5054_s27 + $0xc0] sm:$0xff]  }
  0xdb   : > { %4359 = vrot.lane.b32.xlu1 %v4358_v35, %s4818_s12  ;;  %4027 = vmatprep.subr.bf16.mxu1 %v4429_v31 }
  0xdc   : > { %4004 = vmatpush3.bf16.msra.mxu0 %v4420_v25 }
  0xdd   : > { %4005 = vmatprep.subr.bf16.mxu0 %v4423_v28  ;;  %v4443_v28 = vld [vmem:[%s5054_s27 + $0x178] sm:$0xff]  }
  0xde   : > { %4028 = vmatpush3.bf16.msra.mxu1 %v4430_v45 }
  0xdf   : > { %4029 = vmatprep.subr.bf16.mxu1 %v4433_v34 }
  0xe0   : > { %4006 = vmatpush3.bf16.msra.mxu0 %v4424_v32 }
  0xe1   : > { %4007 = vmatprep.subr.bf16.mxu0 %v4427_v27 }
  0xe2   : > { %4030 = vmatpush3.bf16.msra.mxu1 %v4434_v50 }
  0xe3   : > { %4031 = vmatprep.subr.bf16.mxu1 %v4437_v22 }
  0xe4   : > { %4008 = vmatpush3.bf16.msra.mxu0 %v4428_v42 }
  0xe5   : > { %4009 = vmatprep.subr.bf16.mxu0 %v4431_v48 }
  0xe6   : > { %4032 = vmatpush3.bf16.msra.mxu1 %v4438_v5 }
  0xe7   : > { %4033 = vmatprep.subr.bf16.mxu1 %v4441_v44 }
  0xe8   : > { %4010 = vmatpush3.bf16.msra.mxu0 %v4432_v33 }
  0xe9   : > { %4011 = vmatprep.subr.bf16.mxu0 %v4435_v21 }
  0xea   : > { %4034 = vmatpush3.bf16.msra.mxu1 %v4442_v23 }
  0xeb   : > { %4035 = vmatprep.subr.bf16.mxu1 %v4444_v26 }
  0xec   : > { %4012 = vmatpush3.bf16.msra.mxu0 %v4436_v52 }
  0xed   : > { %4013 = vmatprep.subr.bf16.mxu0 %v4439_v46 }
  0xf0   : > { %4014 = vmatpush3.bf16.msra.mxu0 %v4440_v47 }
  0xf1   : > { %4043 = vmatprep.subr.bf16.mxu0 %v4443_v28 }
 0x13a   : > { %v4315_v54 = vpop.permute.xlu0 %4314 }
 0x13b   : > { %v4317_v55 = vunpack.i.h.bf16 %v4315_v54  ;;  %v4316_v56 = vunpack.i.l.bf16 %v4315_v54  ;;  %v4320_v57 = vpop.permute.xlu1 %4319  ;;  %v4446_v54 = vld [vmem:[%s5054_s27 + $0x80] sm:$0xff]  }
 0x13c   : > { %v4322_v59 = vunpack.i.h.bf16 %v4320_v57  ;;  %v4321_v60 = vunpack.i.l.bf16 %v4320_v57  ;;  %4036 = vmatpush3.bf16.msra.mxu1 %v4446_v54 }
 0x13e   : > { %v735_v0 = vsel %vm717_vm2, %v4317_v55, %v4322_v59  ;;  %v734_v40 = vsel %vm717_vm2, %v4316_v56, %v4321_v60  ;;  %v4325_v1 = vpop.permute.xlu0 %4324 }
 0x13f   : > { %v4327_v41 = vunpack.i.h.bf16 %v4325_v1  ;;  %v4326_v37 = vunpack.i.l.bf16 %v4325_v1  ;;  %v5290_v38 = vmax.f32 %v5149_v13, %v734_v40  ;;  %v5293_v4 = vmax.f32 %v5151_v14, %v735_v0  ;;  %v4448_v0 = vld [vmem:[%s5054_s27 + $0x1f8] sm:$0xff]  }
 0x140   : > { %4065 = vmatprep.subr.bf16.mxu1 %v4448_v0 }
 0x141   : > { %v736_v11 = vsel %vm717_vm2, %v4326_v37, %v4316_v56  ;;  %v737_v12 = vsel %vm717_vm2, %v4327_v41, %v4317_v55  ;;  %v5303_v15 = vpop.permute.xlu1 %4329  ;;  %v4368_v13 = vpack.i.bf16 %v5293_v4, %v5290_v38 }
 0x142   : > { %v4332_v14 = vunpack.i.h.bf16 %v5303_v15  ;;  %v4331_v16 = vunpack.i.l.bf16 %v5303_v15  ;;  %v4335_v35 = vpop.permute.xlu0 %4334  ;;  %v5310_v36 = vmax.f32 %v5145_v8, %v736_v11  ;;  %v5313_v17 = vmax.f32 %v5147_v9, %v737_v12 }
 0x143   : > { %v4337_v19 = vunpack.i.h.bf16 %v4335_v35  ;;  %v4336_v20 = vunpack.i.l.bf16 %v4335_v35  ;;  %4369 = vrot.lane.b32.xlu1 %v4368_v13, %s4819_s26 }
 0x144   : > { %v719_v25 = vsel %vm717_vm2, %v4332_v14, %v4327_v41  ;;  %v718_v8 = vsel %vm717_vm2, %v4331_v16, %v4326_v37  ;;  %v4363_v9 = vpack.i.bf16 %v5313_v17, %v5310_v36 }
 0x145   : > { %v732_v31 = vsel %vm717_vm2, %v4321_v60, %v4336_v20  ;;  %v733_v32 = vsel %vm717_vm2, %v4322_v59, %v4337_v19  ;;  %v4340_v27 = vpop.permute.xlu1 %4339  ;;  %v5334_v42 = vmax.f32 %v5156_v18, %v718_v8  ;;  %v5337_v45 = vmax.f32 %v5165_v24, %v719_v25 }
 0x146   : > { %v4342_v48 = vunpack.i.h.bf16 %v4340_v27  ;;  %v4341_v33 = vunpack.i.l.bf16 %v4340_v27  ;;  %v4345_v34 = vpop.permute.xlu0 %4344  ;;  %4364 = vrot.lane.b32.xlu0 %v4363_v9, %s4819_s26  ;;  %v5341_v50 = vmax.f32 %v5173_v29, %v732_v31  ;;  %v5344_v21 = vmax.f32 %v5176_v30, %v733_v32 }
 0x147   : > { %v4347_v52 = vunpack.i.h.bf16 %v4345_v34  ;;  %v4346_v18 = vunpack.i.l.bf16 %v4345_v34  ;;  %v4373_v55 = vpack.i.bf16 %v5337_v45, %v5334_v42 }
 0x148   : > { %v731_v24 = vsel %vm717_vm2, %v4337_v19, %v4342_v48  ;;  %v730_v22 = vsel %vm717_vm2, %v4336_v20, %v4341_v33  ;;  %v4378_v29 = vpack.i.bf16 %v5344_v21, %v5341_v50 }
 0x149   : > { %v728_v30 = vsel %vm717_vm2, %v4341_v33, %v4346_v18  ;;  %v729_v56 = vsel %vm717_vm2, %v4342_v48, %v4347_v52  ;;  %v4350_v57 = vpop.permute.xlu1 %4349  ;;  %v5360_v59 = vmax.f32 %v5201_v58, %v730_v22  ;;  %v5363_v60 = vmax.f32 %v5204_v61, %v731_v24 }
 0x14a   : > { %v4352_v40 = vunpack.i.h.bf16 %v4350_v57  ;;  %v4351_v1 = vunpack.i.l.bf16 %v4350_v57  ;;  %v4355_v41 = vpop.permute.xlu0 %4354  ;;  %4374 = vrot.lane.b32.xlu0 %v4373_v55, %s4819_s26  ;;  %4379 = vrot.lane.b32.xlu1 %v4378_v29, %s4819_s26  ;;  %v5369_v37 = vmax.f32 %v5207_v62, %v728_v30  ;;  %v5372_v5 = vmax.f32 %v5211_v63, %v729_v56 }
 0x14b   : > { %v4357_v58 = vunpack.i.h.bf16 %v4355_v41  ;;  %v4356_v46 = vunpack.i.l.bf16 %v4355_v41  ;;  %v4383_v44 = vpack.i.bf16 %v5363_v60, %v5360_v59 }
 0x14c   : > { %v727_v61 = vsel %vm717_vm2, %v4347_v52, %v4352_v40  ;;  %v726_v47 = vsel %vm717_vm2, %v4346_v18, %v4351_v1  ;;  %v4388_v11 = vpack.i.bf16 %v5372_v5, %v5369_v37 }
 0x14d   : > { %v724_v62 = vsel %vm717_vm2, %v4351_v1, %v4356_v46  ;;  %v725_v63 = vsel %vm717_vm2, %v4352_v40, %v4357_v58  ;;  %v4360_v12 = vpop.permute.xlu1 %4359  ;;  %v5387_v13 = vmax.f32 %v5227_v2, %v726_v47  ;;  %v5390_v35 = vmax.f32 %v5230_v3, %v727_v61  ;;  %v4445_v61 = vld [vmem:[%s5054_s27 + $0x138] sm:$0xff]  }
 0x14e   : > { %v4362_v19 = vunpack.i.h.bf16 %v4360_v12  ;;  %v4361_v20 = vunpack.i.l.bf16 %v4360_v12  ;;  %4384 = vrot.lane.b32.xlu0 %v4383_v44, %s4819_s26  ;;  %4389 = vrot.lane.b32.xlu1 %v4388_v11, %s4819_s26  ;;  %v5395_v23 = vmax.f32 %v5237_v6, %v724_v62  ;;  %v5398_v25 = vmax.f32 %v5240_v7, %v725_v63  ;;  %v4447_v44 = vld [vmem:[%s5054_s27 + $0x170] sm:$0xff]  }
 0x14f   : > { %v4393_v8 = vpack.i.bf16 %v5390_v35, %v5387_v13 }
 0x150   : > { %v723_v2 = vsel %vm717_vm2, %v4357_v58, %v4362_v19  ;;  %v720_v3 = vsel %vm717_vm2, %v4361_v20, %v4331_v16  ;;  %v721_v6 = vsel %vm717_vm2, %v4362_v19, %v4332_v14  ;;  %v722_v7 = vsel %vm717_vm2, %v4356_v46, %v4361_v20 }
 0x151   : > { %v4398_v9 = vpack.i.bf16 %v5398_v25, %v5395_v23  ;;  %v5417_v28 = vmax.f32 %v5249_v10, %v722_v7  ;;  %v5420_v26 = vmax.f32 %v5252_v43, %v723_v2  ;;  %v5423_v31 = vmax.f32 %v5180_v39, %v720_v3  ;;  %v4450_v7 = vld [vmem:[%s5054_s27 + $0x1b8] sm:$0xff]  }
 0x152   : > { %4394 = vrot.lane.b32.xlu0 %v4393_v8, %s4819_s26  ;;  %v5427_v15 = vmax.f32 %v5185_v49, %v721_v6 }
 0x153   : > { %4399 = vrot.lane.b32.xlu1 %v4398_v9, %s4819_s26  ;;  %v4403_v14 = vpack.i.bf16 %v5420_v26, %v5417_v28 }
 0x154   : > { %v4408_v10 = vpack.i.bf16 %v5427_v15, %v5423_v31 }
 0x156   : > { %4404 = vrot.lane.b32.xlu0 %v4403_v14, %s4819_s26 }
 0x157   : > { %4409 = vrot.lane.b32.xlu1 %v4408_v10, %s4819_s26  ;;  %v4453_v10 = vld [vmem:[%s5054_s27 + $0x1f0] sm:$0xff]   ;;  %s6387_s26 = sld [smem:[#allocation16_spill]] (!%p3792_p5) }
 0x1b5   : > { %v4370_v43 = vpop.permute.xlu1 %4369 }
 0x1b6   : > { %v4372_v16 = vunpack.i.h.bf16 %v4370_v43  ;;  %v4371_v32 = vunpack.i.l.bf16 %v4370_v43 }
 0x1b8   : > { %v4365_v39 = vpop.permute.xlu0 %4364 }
 0x1b9   : > { %v4367_v49 = vunpack.i.h.bf16 %v4365_v39  ;;  %v4366_v27 = vunpack.i.l.bf16 %v4365_v39 }
 0x1bb   : > { %v815_v48 = vsel %vm798_vm3, %v4366_v27, %v4371_v32  ;;  %v816_v33 = vsel %vm798_vm3, %v4367_v49, %v4372_v16 }
 0x1bc   : > { %v5441_v34 = vpop.permute.xlu0 %4374  ;;  %v4380_v52 = vpop.permute.xlu1 %4379  ;;  %v820_v18 = vmax.f32 %v5290_v38, %v815_v48  ;;  %v830_v54 = vmax.f32 %v5293_v4, %v816_v33  ;;  %v4452_v33 = vld [vmem:[%s5054_s27 + $0x128] sm:$0xff]  }
 0x1bd   : > { %v4377_v24 = vunpack.i.h.bf16 %v5441_v34  ;;  %v4376_v22 = vunpack.i.l.bf16 %v5441_v34  ;;  %v4382_v55 = vunpack.i.h.bf16 %v4380_v52  ;;  %v4381_v29 = vunpack.i.l.bf16 %v4380_v52  ;;  %v4454_v52 = vld [vmem:[%s5054_s27 + $0x1b0] sm:$0xff]   ;;  %v4476_v34 = vld [vmem:[%s5054_s27 + $0x1c0] sm:$0xff]  }
 0x1be   : > { %v842_v30 = vpack.c.bf16 %v830_v54, %v820_v18 }
 0x1bf   : > { %v818_v56 = vsel %vm798_vm3, %v4377_v24, %v4367_v49  ;;  %v817_v38 = vsel %vm798_vm3, %v4376_v22, %v4366_v27  ;;  %v814_v4 = vsel %vm798_vm3, %v4372_v16, %v4382_v55  ;;  %v813_v57 = vsel %vm798_vm3, %v4371_v32, %v4381_v29 }
 0x1c0   : > { %v5459_v0 = vpop.permute.xlu0 %4384  ;;  %1523 = vmatprep.mubr.bf16.mxu0 %v842_v30  ;;  %v5461_v40 = vpop.permute.xlu1 %4389  ;;  %v819_v1 = vmax.f32 %v5310_v36, %v817_v38  ;;  %v829_v41 = vmax.f32 %v5313_v17, %v818_v56  ;;  %v821_v17 = vmax.f32 %v5341_v50, %v813_v57  ;;  %v831_v62 = vmax.f32 %v5344_v21, %v814_v4  ;;  %v4449_v50 = vld [vmem:[%s5054_s27 + $0x130] sm:$0xff]   ;;  %v4458_v38 = vld [vmem:[%s5054_s27 + $0x1a8] sm:$0xff]   ;;  %v4459_v4 = vld [vmem:[%s5054_s27 + $0x158] sm:$0xff]  }
 0x1c1   : > { %v4387_v58 = vunpack.i.h.bf16 %v5459_v0  ;;  %v4386_v46 = vunpack.i.l.bf16 %v5459_v0  ;;  %v4392_v20 = vunpack.i.h.bf16 %v5461_v40  ;;  %v4391_v8 = vunpack.i.l.bf16 %v5461_v40  ;;  %v4472_v0 = vld [vmem:[%s5054_s27 + $0x100] sm:$0xff]  }
 0x1c2   : > { %v841_v47 = vpack.c.bf16 %v829_v41, %v819_v1  ;;  %v843_v14 = vpack.c.bf16 %v831_v62, %v821_v17  ;;  %v4461_v1 = vld [vmem:[%s5054_s27 + $0x1e0] sm:$0xff]   ;;  %v4460_v41 = vld [vmem:[%s5054_s27 + $0x118] sm:$0xff]   ;;  %v4469_v17 = vld [vmem:[%s5054_s27 + $0x1d0] sm:$0xff]  }
 0x1c3   : > { %v811_v11 = vsel %vm798_vm3, %v4381_v29, %v4386_v46  ;;  %v812_v36 = vsel %vm798_vm3, %v4382_v55, %v4387_v58  ;;  %v4457_v55 = vld [vmem:[%s5054_s27 + $0x1e8] sm:$0xff]   ;;  %v4456_v29 = vld [vmem:[%s5054_s27 + $0x120] sm:$0xff]  }
 0x1c4   : > { %v5479_v63 = vpop.permute.xlu0 %4394  ;;  %1524 = vmatmul.mubr.bf16.vlgmr.msra.gmra.mxu0 %v841_v47  ;;  %v822_v12 = vmax.f32 %v5360_v59, %v811_v11  ;;  %v832_v19 = vmax.f32 %v5363_v60, %v812_v36  ;;  %v4451_v59 = vld [vmem:[%s5054_s27 + $0x168] sm:$0xff]   ;;  %v4466_v11 = vld [vmem:[%s5054_s27 + $0x198] sm:$0xff]  }
 0x1c5   : > { %v4397_v2 = vunpack.i.h.bf16 %v5479_v63  ;;  %v4396_v3 = vunpack.i.l.bf16 %v5479_v63  ;;  %4044 = vmatpush3.bf16.msra.mxu0 %v4445_v61  ;;  %v5488_v6 = vpop.permute.xlu1 %4399  ;;  %v4465_v61 = vld [vmem:[%s5054_s27 + $0x1d8] sm:$0xff]   ;;  %v4467_v36 = vld [vmem:[%s5054_s27 + $0x148] sm:$0xff]  }
 0x1c6   : > { %4045 = vmatprep.subr.bf16.mxu0 %v4447_v44  ;;  %v844_v21 = vpack.c.bf16 %v832_v19, %v822_v12  ;;  %v4402_v32 = vunpack.i.h.bf16 %v5488_v6  ;;  %v4401_v49 = vunpack.i.l.bf16 %v5488_v6  ;;  %v4464_v44 = vld [vmem:[%s5054_s27 + $0x110] sm:$0xff]   ;;  %v4468_v19 = vld [vmem:[%s5054_s27 + $0x108] sm:$0xff]  }
 0x1c7   : > { %v807_v60 = vsel %vm798_vm3, %v4391_v8, %v4396_v3  ;;  %v808_v9 = vsel %vm798_vm3, %v4392_v20, %v4397_v2  ;;  %v4481_v6 = vld [vmem:[%s5054_s27 + $0x268] sm:$0xff]  }
 0x1c8   : > { %v5505_v43 = vpop.permute.xlu0 %4404  ;;  %1564 = vmatprep.mubr.bf16.mxu1 %v844_v21  ;;  %v824_v39 = vmax.f32 %v5387_v13, %v807_v60  ;;  %v834_v16 = vmax.f32 %v5390_v35, %v808_v9  ;;  %v4455_v35 = vld [vmem:[%s5054_s27 + $0x160] sm:$0xff]   ;;  %v4473_v60 = vld [vmem:[%s5054_s27 + $0x1c8] sm:$0xff]  }
 0x1c9   : > { %v4407_v27 = vunpack.i.h.bf16 %v5505_v43  ;;  %v4406_v48 = vunpack.i.l.bf16 %v5505_v43  ;;  %4046 = vmatpush3.bf16.msra.mxu0 %v4449_v50  ;;  %1565 = vmatmul.mubr.bf16.vlgmr.msra.gmra.mxu1 %v843_v14  ;;  %v5539_v47 = vpop.permute.xlu1 %4409  ;;  %v4470_v50 = vld [vmem:[%s5054_s27 + $0x190] sm:$0xff]   ;;  %v4471_v21 = vld [vmem:[%s5054_s27 + $0x140] sm:$0xff]  }
 0x1ca   : > { %4066 = vmatpush3.bf16.msra.mxu1 %v4450_v7  ;;  %4047 = vmatprep.subr.bf16.mxu0 %v4451_v59  ;;  %v846_v13 = vpack.c.bf16 %v834_v16, %v824_v39  ;;  %v4412_v62 = vunpack.i.h.bf16 %v5539_v47  ;;  %v4411_v12 = vunpack.i.l.bf16 %v5539_v47  ;;  %v810_v7 = vsel %vm798_vm3, %v4387_v58, %v4392_v20  ;;  %v4474_v20 = vld [vmem:[%s5054_s27 + $0x188] sm:$0xff]  }
 0x1cb   : > { %v803_v18 = vsel %vm798_vm3, %v4401_v49, %v4406_v48  ;;  %v804_v54 = vsel %vm798_vm3, %v4402_v32, %v4407_v27  ;;  %4067 = vmatprep.subr.bf16.mxu1 %v4453_v10  ;;  %v809_v59 = vsel %vm798_vm3, %v4386_v46, %v4391_v8  ;;  %v833_v58 = vmax.f32 %v5372_v5, %v810_v7  ;;  %v4479_v10 = vld [vmem:[%s5054_s27 + $0x270] sm:$0xff]  }
 0x1cc   : > { %1605 = vmatprep.mubr.bf16.mxu0 %v846_v13  ;;  %v826_v30 = vmax.f32 %v5417_v28, %v803_v18  ;;  %v836_v56 = vmax.f32 %v5420_v26, %v804_v54  ;;  %v4462_v28 = vld [vmem:[%s5054_s27 + $0x1a0] sm:$0xff]   ;;  %v4463_v26 = vld [vmem:[%s5054_s27 + $0x150] sm:$0xff]   ;;  %v800_v9 = vsel %vm798_vm3, %v4412_v62, %v4377_v24  ;;  %v799_v40 = vsel %vm798_vm3, %v4411_v12, %v4376_v22  ;;  %v4475_v24 = vld [vmem:[%s5054_s27 + $0x278] sm:$0xff]  }
 0x1cd   : > { %4048 = vmatpush3.bf16.msra.mxu0 %v4452_v33  ;;  %v823_v46 = vmax.f32 %v5369_v37, %v809_v59  ;;  %v828_v8 = vmax.f32 %v5334_v42, %v799_v40  ;;  %v838_v14 = vmax.f32 %v5337_v45, %v800_v9  ;;  %v806_v5 = vsel %vm798_vm3, %v4397_v2, %v4402_v32  ;;  %v4477_v22 = vld [vmem:[%s5054_s27 + $0x238] sm:$0xff]   ;;  %v4478_v45 = vld [vmem:[%s5054_s27 + $0x180] sm:$0xff]   ;;  %v4487_v13 = vld [vmem:[%s5054_s27 + $0x250] sm:$0xff]  }
 0x1ce   : > { %4068 = vmatpush3.bf16.msra.mxu1 %v4454_v52  ;;  %4049 = vmatprep.subr.bf16.mxu0 %v4455_v35  ;;  %v848_v57 = vpack.c.bf16 %v836_v56, %v826_v30  ;;  %v805_v37 = vsel %vm798_vm3, %v4396_v3, %v4401_v49  ;;  %v835_v39 = vmax.f32 %v5398_v25, %v806_v5  ;;  %v4480_v3 = vld [vmem:[%s5054_s27 + $0x230] sm:$0xff]   ;;  %v4482_v25 = vld [vmem:[%s5054_s27 + $0x228] sm:$0xff]   ;;  %v4484_v32 = vld [vmem:[%s5054_s27 + $0x220] sm:$0xff]  }
 0x1cf   : > { %4069 = vmatprep.subr.bf16.mxu1 %v4457_v55  ;;  %v845_v42 = vpack.c.bf16 %v833_v58, %v823_v46  ;;  %v825_v2 = vmax.f32 %v5395_v23, %v805_v37  ;;  %v850_v63 = vpack.c.bf16 %v838_v14, %v828_v8  ;;  %v4483_v23 = vld [vmem:[%s5054_s27 + $0x260] sm:$0xff]   ;;  %v4485_v49 = vld [vmem:[%s5054_s27 + $0x258] sm:$0xff]   ;;  %v4488_v52 = vld [vmem:[%s5054_s27 + $0x210] sm:$0xff]   ;;  %v802_v55 = vsel %vm798_vm3, %v4407_v27, %v4412_v62 }
 0x1d0   : > { %1646 = vmatprep.mubr.bf16.mxu1 %v848_v57  ;;  %v4486_v33 = vld [vmem:[%s5054_s27 + $0x218] sm:$0xff]   ;;  %v4489_v35 = vld [vmem:[%s5054_s27 + $0x248] sm:$0xff]   ;;  %v4491_v54 = vld [vmem:[%s5054_s27 + $0x240] sm:$0xff]   ;;  %v837_v56 = vmax.f32 %v5427_v15, %v802_v55 }
 0x1d1   : > { %4050 = vmatpush3.bf16.msra.mxu0 %v4456_v29  ;;  %v847_v16 = vpack.c.bf16 %v835_v39, %v825_v2  ;;  %v4490_v18 = vld [vmem:[%s5054_s27 + $0x208] sm:$0xff]   ;;  %v801_v29 = vsel %vm798_vm3, %v4406_v48, %v4411_v12  ;;  %v4492_v30 = vld [vmem:[%s5054_s27 + $0x200] sm:$0xff]  }
 0x1d2   : > { %4070 = vmatpush3.bf16.msra.mxu1 %v4458_v38  ;;  %4051 = vmatprep.subr.bf16.mxu0 %v4459_v4  ;;  %v827_v38 = vmax.f32 %v5423_v31, %v801_v29 }
 0x1d3   : > { %4071 = vmatprep.subr.bf16.mxu1 %v4461_v1 }
 0x1d4   : > { %v849_v4 = vpack.c.bf16 %v837_v56, %v827_v38 }
 0x1d5   : > { %4052 = vmatpush3.bf16.msra.mxu0 %v4460_v41 }
 0x1d6   : > { %4072 = vmatpush3.bf16.msra.mxu1 %v4462_v28  ;;  %4053 = vmatprep.subr.bf16.mxu0 %v4463_v26 }
 0x1d7   : > { %4073 = vmatprep.subr.bf16.mxu1 %v4465_v61 }
 0x1d9   : > { %4054 = vmatpush3.bf16.msra.mxu0 %v4464_v44 }
 0x1da   : > { %4074 = vmatpush3.bf16.msra.mxu1 %v4466_v11  ;;  %4055 = vmatprep.subr.bf16.mxu0 %v4467_v36 }
 0x1db   : > { %4075 = vmatprep.subr.bf16.mxu1 %v4469_v17 }
 0x1dd   : > { %4056 = vmatpush3.bf16.msra.mxu0 %v4468_v19 }
 0x1de   : > { %4076 = vmatpush3.bf16.msra.mxu1 %v4470_v50  ;;  %4057 = vmatprep.subr.bf16.mxu0 %v4471_v21 }
 0x1df   : > { %4077 = vmatprep.subr.bf16.mxu1 %v4473_v60 }
 0x1e1   : > { %4058 = vmatpush3.bf16.msra.mxu0 %v4472_v0 }
 0x1e2   : > { %4078 = vmatpush3.bf16.msra.mxu1 %v4474_v20  ;;  %4087 = vmatprep.subr.bf16.mxu0 %v4475_v24  ;;  %v839_v24 = vld [vmem:[#allocation2] sm:$0xff] }
 0x1e3   : > { %4079 = vmatprep.subr.bf16.mxu1 %v4476_v34 }
 0x1e4   : > { %1606 = vmatmul.mubr.bf16.vlgmr.msra.gmra.mxu0 %v845_v42 }
 0x1e5   : > { %4088 = vmatpush3.bf16.msra.mxu0 %v4477_v22  ;;  %1687 = vmatprep.mubr.bf16.mxu0 %v850_v63 }
 0x1e6   : > { %4080 = vmatpush3.bf16.msra.mxu1 %v4478_v45  ;;  %4089 = vmatprep.subr.bf16.mxu0 %v4479_v10  ;;  %v840_v45 = vld [vmem:[#allocation2 + $0x8] sm:$0xff] }
 0x1e9   : > { %1647 = vmatmul.mubr.bf16.vlgmr.msra.gmra.mxu1 %v847_v16  ;;  %4090 = vmatpush3.bf16.msra.mxu0 %v4480_v3 }
 0x1ea   : > { %4091 = vmatprep.subr.bf16.mxu0 %v4481_v6 }
 0x1ed   : > { %4092 = vmatpush3.bf16.msra.mxu0 %v4482_v25 }
 0x1ee   : > { %4093 = vmatprep.subr.bf16.mxu0 %v4483_v23 }
 0x1f1   : > { %4094 = vmatpush3.bf16.msra.mxu0 %v4484_v32 }
 0x1f2   : > { %4095 = vmatprep.subr.bf16.mxu0 %v4485_v49 }
 0x1f5   : > { %4096 = vmatpush3.bf16.msra.mxu0 %v4486_v33 }
 0x1f6   : > { %4097 = vmatprep.subr.bf16.mxu0 %v4487_v13 }
 0x1f9   : > { %4098 = vmatpush3.bf16.msra.mxu0 %v4488_v52 }
 0x1fa   : > { %4099 = vmatprep.subr.bf16.mxu0 %v4489_v35 }
 0x1fd   : > { %4100 = vmatpush3.bf16.msra.mxu0 %v4490_v18 }
 0x1fe   : > { %4101 = vmatprep.subr.bf16.mxu0 %v4491_v54 }
 0x201   : > { %4102 = vmatpush3.bf16.msra.mxu0 %v4492_v30 }
 0x204   : > { %1688 = vmatmul.mubr.bf16.vlgmr.msra.gmra.mxu0 %v849_v4 }
 0x284   : > { %v4015_v57 = vpop.f32.mrf.mxu0 }
 0x286   : > { %v4016_v27 = vpop.f32.mrf.mxu0 }
 0x287   : > { %v4017_v31 = vadd.f32 %v4016_v27, %v4015_v57 }
 0x288   : > { %v4018_v28 = vpop.f32.mrf.mxu0 }
 0x289   : > { %v4037_v1 = vpop.f32.mrf.mxu1 }
 0x28a   : > { %v4019_v43 = vpop.f32.mrf.mxu0 }
 0x28b   : > { %v4038_v41 = vpop.f32.mrf.mxu1  ;;  %v4020_v59 = vadd.f32 %v4019_v43, %v4018_v28 }
 0x28c   : > { %v4039_v15 = vadd.f32 %v4038_v41, %v4037_v1 }
 0x28d   : > { %v4040_v26 = vpop.f32.mrf.mxu1 }
 0x28e   : > { %v1567_v12 = vadd.f32 %v4039_v15, %v4017_v31 }
 0x28f   : > { %v4041_v61 = vpop.f32.mrf.mxu1 }
 0x290   : > { %v4042_v19 = vadd.f32 %v4041_v61, %v4040_v26 }
 0x292   : > { %v1570_v0 = vadd.f32 %v4042_v19, %v4020_v59 }
 0x2a4   : > { %v4059_v53 = vpop.f32.mrf.mxu0 }
 0x2a6   : > { %v4060_v47 = vpop.f32.mrf.mxu0 }
 0x2a7   : > { %v4061_v17 = vadd.f32 %v4060_v47, %v4059_v53 }
 0x2a8   : > { %v4062_v11 = vpop.f32.mrf.mxu0 }
 0x2a9   : > { %v4081_v48 = vpop.f32.mrf.mxu1  ;;  %v1608_v60 = vadd.f32 %v4061_v17, %v1567_v12 }
 0x2aa   : > { %v4063_v62 = vpop.f32.mrf.mxu0 }
 0x2ab   : > { %v4082_v44 = vpop.f32.mrf.mxu1  ;;  %v4064_v9 = vadd.f32 %v4063_v62, %v4062_v11 }
 0x2ac   : > { %v4083_v50 = vadd.f32 %v4082_v44, %v4081_v48 }
 0x2ad   : > { %v4084_v36 = vpop.f32.mrf.mxu1  ;;  %v1611_v8 = vadd.f32 %v4064_v9, %v1570_v0 }
 0x2ae   : > { %v1649_v58 = vadd.f32 %v4083_v50, %v1608_v60 }
 0x2af   : > { %v4085_v21 = vpop.f32.mrf.mxu1 }
 0x2b0   : > { %v4086_v46 = vadd.f32 %v4085_v21, %v4084_v36 }
 0x2b2   : > { %v1652_v37 = vadd.f32 %v4086_v46, %v1611_v8 }
 0x2c4   : > { %v4103_v7 = vpop.f32.mrf.mxu0 }
 0x2c6   : > { %v4104_v40 = vpop.f32.mrf.mxu0 }
 0x2c7   : > { %v4105_v20 = vadd.f32 %v4104_v40, %v4103_v7 }
 0x2c8   : > { %v4106_v34 = vpop.f32.mrf.mxu0 }
 0x2c9   : > { %v1690_v14 = vadd.f32 %v4105_v20, %v1649_v58 }
 0x2ca   : > { %v4107_v5 = vpop.f32.mrf.mxu0 }
 0x2cb   : > { %v1696_v22 = vadd.f32 %v1690_v14, %v839_v24  ;;  %v4108_v42 = vadd.f32 %v4107_v5, %v4106_v34 }
 0x2cd   : > { %1699 = vst.msk [vmem:[#allocation2] sm:$0xff] %vm1698_vm4, %v1696_v22  ;;  %v1693_v10 = vadd.f32 %v4108_v42, %v1652_v37  ;;  %1704 = sbr.rel (%p3792_p5) target bundleno = 2045 (0x7fd), region = 107 }
 0x2cf   : > { %v1697_v39 = vadd.f32 %v1693_v10, %v840_v45 }
 0x2d1   : > { %1700 = vst.msk [vmem:[#allocation2 + $0x8] sm:$0xff] %vm1698_vm4, %v1697_v39 }
 0x2d2   : > { %v1740_v2 = vld [vmem:[%s6351_s2 + $0x100] sm:$0xff]  ;;  %v1741_v3 = vld [vmem:[%s6351_s2 + $0x108] sm:$0xff]  ;;  %v4820_v49 = vmov 0   ;;  %v1742_v62 = vld [vmem:[%s6351_s2 + $0x110] sm:$0xff] }
 0x2d3   : > { %v1744_v63 = vld [vmem:[%s6351_s2 + $0x120] sm:$0xff]  ;;  %v1745_v16 = vld [vmem:[%s6351_s2 + $0x128] sm:$0xff]  ;;  %2025 = vmatprep.mubr.bf16.mxu0 %v4820_v49  ;;  %2068 = vmatprep.mubr.bf16.mxu1 %v4820_v49  ;;  %v1746_v12 = vld [vmem:[%s6351_s2 + $0x130] sm:$0xff] }
 0x2d4   : > { %v3826_v6 = vcombine.high %v1740_v2, %v1744_v63  ;;  %v3825_v25 = vcombine.low %v1740_v2, %v1744_v63  ;;  %v1732_v23 = vld [vmem:[%s6351_s2 + $0xc0] sm:$0xff]  ;;  %v3828_v33 = vcombine.high %v1741_v3, %v1745_v16  ;;  %v3827_v13 = vcombine.low %v1741_v3, %v1745_v16  ;;  %v1733_v35 = vld [vmem:[%s6351_s2 + $0xc8] sm:$0xff]  ;;  %v1743_v50 = vld [vmem:[%s6351_s2 + $0x118] sm:$0xff] }
 0x2d5   : > { %v1736_v32 = vld [vmem:[%s6351_s2 + $0xe0] sm:$0xff]  ;;  %v1737_v18 = vld [vmem:[%s6351_s2 + $0xe8] sm:$0xff]  ;;  %v1747_v21 = vld [vmem:[%s6351_s2 + $0x138] sm:$0xff]  ;;  %v3830_v40 = vcombine.high %v1742_v62, %v1746_v12  ;;  %v3829_v8 = vcombine.low %v1742_v62, %v1746_v12 }
 0x2d6   : > { %v3818_v52 = vcombine.high %v1732_v23, %v1736_v32  ;;  %v1724_v54 = vld [vmem:[%s6351_s2 + $0x80] sm:$0xff]  ;;  %1999 = vmatprep.subr.bf16.mxu0 %v3826_v6  ;;  %v3820_v55 = vcombine.high %v1733_v35, %v1737_v18  ;;  %v1725_v30 = vld [vmem:[%s6351_s2 + $0x88] sm:$0xff]  ;;  %2042 = vmatprep.subr.bf16.mxu1 %v3828_v33  ;;  %v3817_v38 = vcombine.low %v1732_v23, %v1736_v32  ;;  %v1734_v0 = vld [vmem:[%s6351_s2 + $0xd0] sm:$0xff] }
 0x2d7   : > { %v1728_v29 = vld [vmem:[%s6351_s2 + $0xa0] sm:$0xff]  ;;  %v1729_v56 = vld [vmem:[%s6351_s2 + $0xa8] sm:$0xff]  ;;  %2000 = vmatpush1.bf16.msra.mxu0 %v3825_v25  ;;  %2043 = vmatpush1.bf16.msra.mxu1 %v3827_v13  ;;  %v3819_v4 = vcombine.low %v1733_v35, %v1737_v18  ;;  %v1738_v58 = vld [vmem:[%s6351_s2 + $0xf0] sm:$0xff]  ;;  %v3832_v46 = vcombine.high %v1743_v50, %v1747_v21  ;;  %v3831_v14 = vcombine.low %v1743_v50, %v1747_v21 }
 0x2d8   : > { %2001 = vmatprep.subr.bf16.mxu0 %v3818_v52  ;;  %v3810_v57 = vcombine.high %v1724_v54, %v1728_v29  ;;  %2044 = vmatprep.subr.bf16.mxu1 %v3820_v55  ;;  %v3812_v1 = vcombine.high %v1725_v30, %v1729_v56  ;;  %v1716_v27 = vld [vmem:[%s6351_s2 + $0x40] sm:$0xff]  ;;  %v1717_v28 = vld [vmem:[%s6351_s2 + $0x48] sm:$0xff]  ;;  %v3809_v43 = vcombine.low %v1724_v54, %v1728_v29  ;;  %v1735_v20 = vld [vmem:[%s6351_s2 + $0xd8] sm:$0xff] }
 0x2d9   : > { %v1720_v41 = vld [vmem:[%s6351_s2 + $0x60] sm:$0xff]  ;;  %v1721_v26 = vld [vmem:[%s6351_s2 + $0x68] sm:$0xff]  ;;  %v3811_v61 = vcombine.low %v1725_v30, %v1729_v56  ;;  %v1739_v34 = vld [vmem:[%s6351_s2 + $0xf8] sm:$0xff]  ;;  %v3822_v5 = vcombine.high %v1734_v0, %v1738_v58  ;;  %v3821_v39 = vcombine.low %v1734_v0, %v1738_v58 }
 0x2da   : > { %v3802_v53 = vcombine.high %v1716_v27, %v1720_v41  ;;  %v3804_v48 = vcombine.high %v1717_v28, %v1721_v26  ;;  %v1708_v47 = vld [vmem:[%s6351_s2] sm:$0xff]  ;;  %v1709_v11 = vld [vmem:[%s6351_s2 + $0x8] sm:$0xff]  ;;  %v3801_v36 = vcombine.low %v1716_v27, %v1720_v41  ;;  %v3803_v31 = vcombine.low %v1717_v28, %v1721_v26  ;;  %v1726_v37 = vld [vmem:[%s6351_s2 + $0x90] sm:$0xff] }
 0x2db   : > { %2002 = vmatpush1.bf16.msra.mxu0 %v3817_v38  ;;  %2045 = vmatpush1.bf16.msra.mxu1 %v3819_v4  ;;  %v1712_v44 = vld [vmem:[%s6351_s2 + $0x20] sm:$0xff]  ;;  %v1713_v15 = vld [vmem:[%s6351_s2 + $0x28] sm:$0xff]  ;;  %v1730_v22 = vld [vmem:[%s6351_s2 + $0xb0] sm:$0xff]  ;;  %v3824_v42 = vcombine.high %v1735_v20, %v1739_v34  ;;  %v3823_v2 = vcombine.low %v1735_v20, %v1739_v34 }
 0x2dc   : > { %2003 = vmatprep.subr.bf16.mxu0 %v3810_v57  ;;  %2046 = vmatprep.subr.bf16.mxu1 %v3812_v1  ;;  %v3794_v17 = vcombine.high %v1708_v47, %v1712_v44  ;;  %v3796_v19 = vcombine.high %v1709_v11, %v1713_v15  ;;  %v3793_v7 = vcombine.low %v1708_v47, %v1712_v44  ;;  %v1705_v59 = vld [vmem:[#allocation2] sm:$0xff]  ;;  %v1706_v60 = vld [vmem:[#allocation2 + $0x8] sm:$0xff]  ;;  %v1727_v45 = vld [vmem:[%s6351_s2 + $0x98] sm:$0xff] }
 0x2dd   : > { %v3795_v9 = vcombine.low %v1709_v11, %v1713_v15  ;;  %v5713_v24 = vpack.c.bf16 %v1706_v60, %v1705_v59  ;;  %v1731_v10 = vld [vmem:[%s6351_s2 + $0xb8] sm:$0xff]  ;;  %v3814_v63 = vcombine.high %v1726_v37, %v1730_v22  ;;  %v1718_v3 = vld [vmem:[%s6351_s2 + $0x50] sm:$0xff]  ;;  %v3813_v32 = vcombine.low %v1726_v37, %v1730_v22  ;;  %v4501_v28 = vld [vmem:[%s6353_s4 + $0x64] ss:$8 sps:$4 sm:$0xff]  }
 0x2de   : > { %v1722_v6 = vld [vmem:[%s6351_s2 + $0x70] sm:$0xff]  ;;  %v3816_v16 = vcombine.high %v1727_v45, %v1731_v10  ;;  %v1719_v25 = vld [vmem:[%s6351_s2 + $0x58] sm:$0xff]  ;;  %v3815_v33 = vcombine.low %v1727_v45, %v1731_v10  ;;  %v4504_v26 = vld [vmem:[%s6353_s4 + $0x164] ss:$8 sps:$4 sm:$0xff]  }
 0x2df   : > { %2004 = vmatpush1.bf16.msra.mxu0 %v3809_v43  ;;  %2047 = vmatpush1.bf16.msra.mxu1 %v3811_v61  ;;  %v1723_v23 = vld [vmem:[%s6351_s2 + $0x78] sm:$0xff]  ;;  %v3806_v13 = vcombine.high %v1718_v3, %v1722_v6  ;;  %v1710_v52 = vld [vmem:[%s6351_s2 + $0x10] sm:$0xff]  ;;  %v3805_v55 = vcombine.low %v1718_v3, %v1722_v6  ;;  %v4499_v43 = vld [vmem:[%s6353_s4 + $0x60] ss:$8 sps:$4 sm:$0xff]  }
 0x2e0   : > { %2005 = vmatprep.subr.bf16.mxu0 %v3802_v53  ;;  %2048 = vmatprep.subr.bf16.mxu1 %v3804_v48  ;;  %v1714_v35 = vld [vmem:[%s6351_s2 + $0x30] sm:$0xff]  ;;  %v3808_v18 = vcombine.high %v1719_v25, %v1723_v23  ;;  %v1715_v54 = vld [vmem:[%s6351_s2 + $0x38] sm:$0xff]  ;;  %v3807_v29 = vcombine.low %v1719_v25, %v1723_v23  ;;  %v4502_v61 = vld [vmem:[%s6353_s4 + $0x160] ss:$8 sps:$4 sm:$0xff]  }
 0x2e1   : > { %v3798_v30 = vcombine.high %v1710_v52, %v1714_v35  ;;  %v3797_v38 = vcombine.low %v1710_v52, %v1714_v35  ;;  %v4495_v57 = vld [vmem:[%s6353_s4 + $0x74] ss:$8 sps:$4 sm:$0xff]   ;;  %v4493_v27 = vld [vmem:[%s6353_s4 + $0x70] ss:$8 sps:$4 sm:$0xff]   ;;  %v4513_v11 = vld [vmem:[%s6353_s4 + $0x44] ss:$8 sps:$4 sm:$0xff]  }
 0x2e2   : > { %v4498_v1 = vld [vmem:[%s6353_s4 + $0x174] ss:$8 sps:$4 sm:$0xff]   ;;  %v4496_v41 = vld [vmem:[%s6353_s4 + $0x170] ss:$8 sps:$4 sm:$0xff]   ;;  %v4516_v15 = vld [vmem:[%s6353_s4 + $0x144] ss:$8 sps:$4 sm:$0xff]  }
 0x2e3   : > { %2006 = vmatpush1.bf16.msra.mxu0 %v3801_v36  ;;  %2049 = vmatpush1.bf16.msra.mxu1 %v3803_v31  ;;  %v4507_v53 = vld [vmem:[%s6353_s4 + $0x54] ss:$8 sps:$4 sm:$0xff]   ;;  %v4505_v47 = vld [vmem:[%s6353_s4 + $0x50] ss:$8 sps:$4 sm:$0xff]   ;;  %v4511_v36 = vld [vmem:[%s6353_s4 + $0x40] ss:$8 sps:$4 sm:$0xff]  }
 0x2e4   : > { %2007 = vmatprep.subr.bf16.mxu0 %v3794_v17  ;;  %2050 = vmatprep.subr.bf16.mxu1 %v3796_v19  ;;  %v4510_v48 = vld [vmem:[%s6353_s4 + $0x154] ss:$8 sps:$4 sm:$0xff]   ;;  %v4508_v44 = vld [vmem:[%s6353_s4 + $0x150] ss:$8 sps:$4 sm:$0xff]   ;;  %v4514_v31 = vld [vmem:[%s6353_s4 + $0x140] ss:$8 sps:$4 sm:$0xff]  }
 0x2e5   : > { %v4519_v17 = vld [vmem:[%s6353_s4 + $0x34] ss:$8 sps:$4 sm:$0xff]   ;;  %v4517_v12 = vld [vmem:[%s6353_s4 + $0x30] ss:$8 sps:$4 sm:$0xff]   ;;  %v4525_v50 = vld [vmem:[%s6353_s4 + $0x24] ss:$8 sps:$4 sm:$0xff]  }
 0x2e6   : > { %v4522_v62 = vld [vmem:[%s6353_s4 + $0x134] ss:$8 sps:$4 sm:$0xff]   ;;  %v4520_v19 = vld [vmem:[%s6353_s4 + $0x130] ss:$8 sps:$4 sm:$0xff]   ;;  %v4528_v21 = vld [vmem:[%s6353_s4 + $0x124] ss:$8 sps:$4 sm:$0xff]  }
 0x2e7   : > { %2008 = vmatpush1.bf16.msra.mxu0 %v3793_v7  ;;  %2051 = vmatpush1.bf16.msra.mxu1 %v3795_v9  ;;  %v4523_v7 = vld [vmem:[%s6353_s4 + $0x20] ss:$8 sps:$4 sm:$0xff]   ;;  %v4531_v60 = vld [vmem:[%s6353_s4 + $0x14] ss:$8 sps:$4 sm:$0xff]   ;;  %v4532_v0 = vld [vmem:[%s6353_s4 + $0x110] ss:$8 sps:$4 sm:$0xff]  }
 0x2e8   : > { %2085 = vmatprep.subr.bf16.mxu0 %v3830_v40  ;;  %2128 = vmatprep.subr.bf16.mxu1 %v3832_v46  ;;  %v4526_v59 = vld [vmem:[%s6353_s4 + $0x120] ss:$8 sps:$4 sm:$0xff]   ;;  %v4534_v9 = vld [vmem:[%s6353_s4 + $0x114] ss:$8 sps:$4 sm:$0xff]   ;;  %v4529_v40 = vld [vmem:[%s6353_s4 + $0x10] ss:$8 sps:$4 sm:$0xff]  }
 0x2e9   : > { %v4537_v58 = vld [vmem:[%s6353_s4 + $0x4] ss:$8 sps:$4 sm:$0xff]   ;;  %v4535_v20 = vld [vmem:[%s6353_s4] ss:$8 sps:$4 sm:$0xff]   ;;  %v4543_v34 = vld [vmem:[%s6353_s4 + $0xf4] ss:$8 sps:$4 sm:$0xff]  }
 0x2ea   : > { %3833 = vmatmul.mubr.msk.bf16.vlgmr.msra.gmra.mxu0 %vm1698_vm4, %v5713_v24  ;;  %3834 = vmatmul.mubr.msk.bf16.vlgmr.msra.gmra.mxu1 %vm1698_vm4, %v5713_v24  ;;  %v4540_v46 = vld [vmem:[%s6353_s4 + $0x104] ss:$8 sps:$4 sm:$0xff]   ;;  %v4550_v45 = vld [vmem:[%s6353_s4 + $0x1e0] ss:$8 sps:$4 sm:$0xff]   ;;  %v4555_v10 = vld [vmem:[%s6353_s4 + $0xd4] ss:$8 sps:$4 sm:$0xff]  }
 0x2eb   : > { %2086 = vmatpush1.bf16.msra.mxu0 %v3829_v8  ;;  %2129 = vmatpush1.bf16.msra.mxu1 %v3831_v14  ;;  %v4546_v8 = vld [vmem:[%s6353_s4 + $0x1f4] ss:$8 sps:$4 sm:$0xff]   ;;  %v4541_v14 = vld [vmem:[%s6353_s4 + $0xf0] ss:$8 sps:$4 sm:$0xff]   ;;  %v4549_v37 = vld [vmem:[%s6353_s4 + $0xe4] ss:$8 sps:$4 sm:$0xff]  }
 0x2ec   : > { %2087 = vmatprep.subr.bf16.mxu0 %v3822_v5  ;;  %2130 = vmatprep.subr.bf16.mxu1 %v3824_v42  ;;  %v4544_v5 = vld [vmem:[%s6353_s4 + $0x1f0] ss:$8 sps:$4 sm:$0xff]   ;;  %v4552_v22 = vld [vmem:[%s6353_s4 + $0x1e4] ss:$8 sps:$4 sm:$0xff]   ;;  %v4547_v42 = vld [vmem:[%s6353_s4 + $0xe0] ss:$8 sps:$4 sm:$0xff]  }
 0x2ed   : > { %2111 = vmatprep.mubr.bf16.mxu0 %v4820_v49  ;;  %2154 = vmatprep.mubr.bf16.mxu1 %v4820_v49  ;;  %v1711_v49 = vld [vmem:[%s6351_s2 + $0x18] sm:$0xff]  ;;  %v4561_v3 = vld [vmem:[%s6353_s4 + $0xc4] ss:$8 sps:$4 sm:$0xff]   ;;  %v4562_v25 = vld [vmem:[%s6353_s4 + $0x1c0] ss:$8 sps:$4 sm:$0xff]  }
 0x2ee   : > { %v3800_v56 = vcombine.high %v1711_v49, %v1715_v54  ;;  %v3799_v4 = vcombine.low %v1711_v49, %v1715_v54  ;;  %v4564_v6 = vld [vmem:[%s6353_s4 + $0x1c4] ss:$8 sps:$4 sm:$0xff]   ;;  %v4567_v23 = vld [vmem:[%s6353_s4 + $0xb4] ss:$8 sps:$4 sm:$0xff]   ;;  %v4574_v49 = vld [vmem:[%s6353_s4 + $0x1a0] ss:$8 sps:$4 sm:$0xff]  }
 0x2ef   : > { %2088 = vmatpush1.bf16.msra.mxu0 %v3821_v39  ;;  %2131 = vmatpush1.bf16.msra.mxu1 %v3823_v2  ;;  %v4558_v39 = vld [vmem:[%s6353_s4 + $0x1d4] ss:$8 sps:$4 sm:$0xff]   ;;  %v4553_v2 = vld [vmem:[%s6353_s4 + $0xd0] ss:$8 sps:$4 sm:$0xff]   ;;  %v4573_v52 = vld [vmem:[%s6353_s4 + $0xa4] ss:$8 sps:$4 sm:$0xff]  }
 0x2f0   : > { %2089 = vmatprep.subr.bf16.mxu0 %v3814_v63  ;;  %2132 = vmatprep.subr.bf16.mxu1 %v3816_v16  ;;  %v4556_v63 = vld [vmem:[%s6353_s4 + $0x1d0] ss:$8 sps:$4 sm:$0xff]   ;;  %v4559_v16 = vld [vmem:[%s6353_s4 + $0xc0] ss:$8 sps:$4 sm:$0xff]   ;;  %v4576_v35 = vld [vmem:[%s6353_s4 + $0x1a4] ss:$8 sps:$4 sm:$0xff]  }
 0x2f1   : > { %v4579_v54 = vld [vmem:[%s6353_s4 + $0x94] ss:$8 sps:$4 sm:$0xff]  }
 0x2f3   : > { %2090 = vmatpush1.bf16.msra.mxu0 %v3813_v32  ;;  %2133 = vmatpush1.bf16.msra.mxu1 %v3815_v33  ;;  %v4570_v32 = vld [vmem:[%s6353_s4 + $0x1b4] ss:$8 sps:$4 sm:$0xff]   ;;  %v4565_v33 = vld [vmem:[%s6353_s4 + $0xb0] ss:$8 sps:$4 sm:$0xff]  }
 0x2f4   : > { %2091 = vmatprep.subr.bf16.mxu0 %v3806_v13  ;;  %2134 = vmatprep.subr.bf16.mxu1 %v3808_v18  ;;  %v4568_v13 = vld [vmem:[%s6353_s4 + $0x1b0] ss:$8 sps:$4 sm:$0xff]   ;;  %v4571_v18 = vld [vmem:[%s6353_s4 + $0xa0] ss:$8 sps:$4 sm:$0xff]  }
 0x2f7   : > { %2092 = vmatpush1.bf16.msra.mxu0 %v3805_v55  ;;  %2135 = vmatpush1.bf16.msra.mxu1 %v3807_v29  ;;  %v4582_v55 = vld [vmem:[%s6353_s4 + $0x194] ss:$8 sps:$4 sm:$0xff]   ;;  %v4577_v29 = vld [vmem:[%s6353_s4 + $0x90] ss:$8 sps:$4 sm:$0xff]  }
 0x2f8   : > { %2093 = vmatprep.subr.bf16.mxu0 %v3798_v30  ;;  %2136 = vmatprep.subr.bf16.mxu1 %v3800_v56  ;;  %v4580_v30 = vld [vmem:[%s6353_s4 + $0x190] ss:$8 sps:$4 sm:$0xff]   ;;  %v4585_v56 = vld [vmem:[%s6353_s4 + $0x84] ss:$8 sps:$4 sm:$0xff]  }
 0x2fb   : > { %2094 = vmatpush1.bf16.msra.mxu0 %v3797_v38  ;;  %2137 = vmatpush1.bf16.msra.mxu1 %v3799_v4  ;;  %v4588_v38 = vld [vmem:[%s6353_s4 + $0x184] ss:$8 sps:$4 sm:$0xff]   ;;  %v4583_v4 = vld [vmem:[%s6353_s4 + $0x80] ss:$8 sps:$4 sm:$0xff]  }
 0x2fc   : > { %3001 = vmatprep.subr.bf16.mxu0 %v4495_v57  ;;  %3044 = vmatprep.subr.bf16.mxu1 %v4498_v1  ;;  %v4586_v57 = vld [vmem:[%s6353_s4 + $0x180] ss:$8 sps:$4 sm:$0xff]   ;;  %v4591_v1 = vld [vmem:[%s6353_s4 + $0x274] ss:$8 sps:$4 sm:$0xff]  }
 0x2fe   : > { %3835 = vmatmul.mubr.msk.bf16.vlgmr.msra.gmra.mxu0 %vm1698_vm4, %v5713_v24  ;;  %3836 = vmatmul.mubr.msk.bf16.vlgmr.msra.gmra.mxu1 %vm1698_vm4, %v5713_v24  ;;  %v4538_v24 = vld [vmem:[%s6353_s4 + $0x100] ss:$8 sps:$4 sm:$0xff]  }
 0x2ff   : > { %3002 = vmatpush1.bf16.msra.mxu0 %v4493_v27  ;;  %3045 = vmatpush1.bf16.msra.mxu1 %v4496_v41  ;;  %v4594_v27 = vld [vmem:[%s6353_s4 + $0x374] ss:$8 sps:$4 sm:$0xff]   ;;  %v5963_v41 = vshrl.u32 %v634_v51, 7 }
 0x300   : > { %3003 = vmatprep.subr.bf16.mxu0 %v4501_v28  ;;  %3046 = vmatprep.subr.bf16.mxu1 %v4504_v26  ;;  %v5969_v26 = vld [vmem:[%s6352_s3] sm:$0xff] }
 0x301   : > { %v1752_v28 = vsub.s32 0, %v5963_v41 }
 0x303   : > { %3004 = vmatpush1.bf16.msra.mxu0 %v4499_v43  ;;  %3047 = vmatpush1.bf16.msra.mxu1 %v4502_v61  ;;  %v1756_v43 = vsub.s32 1, %v5963_v41  ;;  %v1764_v61 = vsub.s32 3, %v5963_v41 }
 0x304   : > { %3005 = vmatprep.subr.bf16.mxu0 %v4507_v53  ;;  %3048 = vmatprep.subr.bf16.mxu1 %v4510_v48  ;;  %v1760_v53 = vsub.s32 2, %v5963_v41  ;;  %v1753_v48 = vrot.slane %v5969_v26, %v1752_v28 }
 0x305   : > { %v1757_v51 = vrot.slane %v5969_v26, %v1756_v43 }
 0x307   : > { %3006 = vmatpush1.bf16.msra.mxu0 %v4505_v47  ;;  %3049 = vmatpush1.bf16.msra.mxu1 %v4508_v44  ;;  %v1765_v44 = vrot.slane %v5969_v26, %v1764_v61 }
 0x308   : > { %3007 = vmatprep.subr.bf16.mxu0 %v4513_v11  ;;  %3050 = vmatprep.subr.bf16.mxu1 %v4516_v15  ;;  %v1761_v11 = vrot.slane %v5969_v26, %v1760_v53 }
 0x30b   : > { %3008 = vmatpush1.bf16.msra.mxu0 %v4511_v36  ;;  %3051 = vmatpush1.bf16.msra.mxu1 %v4514_v31 }
 0x30c   : > { %3009 = vmatprep.subr.bf16.mxu0 %v4519_v17  ;;  %3052 = vmatprep.subr.bf16.mxu1 %v4522_v62 }
 0x30f   : > { %3010 = vmatpush1.bf16.msra.mxu0 %v4517_v12  ;;  %3053 = vmatpush1.bf16.msra.mxu1 %v4520_v19 }
 0x310   : > { %3011 = vmatprep.subr.bf16.mxu0 %v4525_v50  ;;  %3054 = vmatprep.subr.bf16.mxu1 %v4528_v21 }
 0x313   : > { %3012 = vmatpush1.bf16.msra.mxu0 %v4523_v7  ;;  %3055 = vmatpush1.bf16.msra.mxu1 %v4526_v59 }
 0x314   : > { %3013 = vmatprep.subr.bf16.mxu0 %v4531_v60  ;;  %3056 = vmatprep.subr.bf16.mxu1 %v4534_v9 }
 0x317   : > { %3014 = vmatpush1.bf16.msra.mxu0 %v4529_v40  ;;  %3057 = vmatpush1.bf16.msra.mxu1 %v4532_v0 }
 0x318   : > { %3015 = vmatprep.subr.bf16.mxu0 %v4537_v58  ;;  %3058 = vmatprep.subr.bf16.mxu1 %v4540_v46 }
 0x31b   : > { %3016 = vmatpush1.bf16.msra.mxu0 %v4535_v20  ;;  %3059 = vmatpush1.bf16.msra.mxu1 %v4538_v24 }
 0x31c   : > { %3017 = vmatprep.subr.bf16.mxu0 %v4543_v34  ;;  %3060 = vmatprep.subr.bf16.mxu1 %v4546_v8 }
 0x31f   : > { %3018 = vmatpush2.bf16.msra.mxu0 %v4541_v14  ;;  %3061 = vmatpush2.bf16.msra.mxu1 %v4544_v5 }
 0x320   : > { %3019 = vmatprep.subr.bf16.mxu0 %v4549_v37  ;;  %3062 = vmatprep.subr.bf16.mxu1 %v4552_v22 }
 0x323   : > { %3020 = vmatpush2.bf16.msra.mxu0 %v4547_v42  ;;  %3063 = vmatpush2.bf16.msra.mxu1 %v4550_v45 }
 0x324   : > { %3021 = vmatprep.subr.bf16.mxu0 %v4555_v10  ;;  %3064 = vmatprep.subr.bf16.mxu1 %v4558_v39 }
 0x327   : > { %3022 = vmatpush2.bf16.msra.mxu0 %v4553_v2  ;;  %3065 = vmatpush2.bf16.msra.mxu1 %v4556_v63 }
 0x328   : > { %3023 = vmatprep.subr.bf16.mxu0 %v4561_v3  ;;  %3066 = vmatprep.subr.bf16.mxu1 %v4564_v6  ;;  %v4589_v3 = vld [vmem:[%s6353_s4 + $0x270] ss:$8 sps:$4 sm:$0xff]  }
 0x32b   : > { %3024 = vmatpush2.bf16.msra.mxu0 %v4559_v16  ;;  %3067 = vmatpush2.bf16.msra.mxu1 %v4562_v25 }
 0x32c   : > { %3025 = vmatprep.subr.bf16.mxu0 %v4567_v23  ;;  %3068 = vmatprep.subr.bf16.mxu1 %v4570_v32  ;;  %v4592_v23 = vld [vmem:[%s6353_s4 + $0x370] ss:$8 sps:$4 sm:$0xff]   ;;  %v4597_v32 = vld [vmem:[%s6353_s4 + $0x264] ss:$8 sps:$4 sm:$0xff]  }
 0x32f   : > { %3026 = vmatpush2.bf16.msra.mxu0 %v4565_v33  ;;  %3069 = vmatpush2.bf16.msra.mxu1 %v4568_v13  ;;  %v4600_v13 = vld [vmem:[%s6353_s4 + $0x364] ss:$8 sps:$4 sm:$0xff]  }
 0x330   : > { %3027 = vmatprep.subr.bf16.mxu0 %v4573_v52  ;;  %3070 = vmatprep.subr.bf16.mxu1 %v4576_v35  ;;  %v1772_v52 = vsub.s32 5, %v5963_v41  ;;  %v4595_v35 = vld [vmem:[%s6353_s4 + $0x260] ss:$8 sps:$4 sm:$0xff]  }
 0x333   : > { %3028 = vmatpush2.bf16.msra.mxu0 %v4571_v18  ;;  %3071 = vmatpush2.bf16.msra.mxu1 %v4574_v49  ;;  %v1780_v18 = vsub.s32 7, %v5963_v41  ;;  %v4598_v49 = vld [vmem:[%s6353_s4 + $0x360] ss:$8 sps:$4 sm:$0xff]  }
 0x334   : > { %3029 = vmatprep.subr.bf16.mxu0 %v4579_v54  ;;  %3072 = vmatprep.subr.bf16.mxu1 %v4582_v55  ;;  %v4603_v54 = vld [vmem:[%s6353_s4 + $0x254] ss:$8 sps:$4 sm:$0xff]  }
 0x335   : > { %v4606_v55 = vld [vmem:[%s6353_s4 + $0x354] ss:$8 sps:$4 sm:$0xff]  }
 0x337   : > { %3030 = vmatpush2.bf16.msra.mxu0 %v4577_v29  ;;  %3073 = vmatpush2.bf16.msra.mxu1 %v4580_v30  ;;  %v1773_v29 = vrot.slane %v5969_v26, %v1772_v52  ;;  %v4601_v30 = vld [vmem:[%s6353_s4 + $0x250] ss:$8 sps:$4 sm:$0xff]   ;;  %v4651_v52 = vld [vmem:[%s6353_s4 + $0x2d4] ss:$8 sps:$4 sm:$0xff]  }
 0x338   : > { %3031 = vmatprep.subr.bf16.mxu0 %v4585_v56  ;;  %3074 = vmatprep.subr.bf16.mxu1 %v4588_v38  ;;  %v1781_v38 = vrot.slane %v5969_v26, %v1780_v18  ;;  %v4649_v18 = vld [vmem:[%s6353_s4 + $0x2d0] ss:$8 sps:$4 sm:$0xff]  }
 0x33b   : > { %3032 = vmatpush2.bf16.msra.mxu0 %v4583_v4  ;;  %3075 = vmatpush2.bf16.msra.mxu1 %v4586_v57  ;;  %v4604_v4 = vld [vmem:[%s6353_s4 + $0x350] ss:$8 sps:$4 sm:$0xff]   ;;  %v4609_v57 = vld [vmem:[%s6353_s4 + $0x244] ss:$8 sps:$4 sm:$0xff]  }
 0x33c   : > { %3087 = vmatprep.subr.bf16.mxu0 %v4591_v1  ;;  %3130 = vmatprep.subr.bf16.mxu1 %v4594_v27  ;;  %v4612_v27 = vld [vmem:[%s6353_s4 + $0x344] ss:$8 sps:$4 sm:$0xff]  }
 0x3aa   : > { %v2027_v47 = vpop.f32.mrf.mxu0  ;;  %v2070_v15 = vpop.f32.mrf.mxu1 }
 0x3ab   : > { %v2028_v36 = vadd.f32 %v2027_v47, %v1753_v48  ;;  %v2071_v50 = vadd.f32 %v2070_v15, %v1761_v11  ;;  %v4615_v15 = vld [vmem:[%s6353_s4 + $0x234] ss:$8 sps:$4 sm:$0xff]  }
 0x3ac   : > { %v2029_v31 = vpop.f32.mrf.mxu0  ;;  %v2072_v62 = vpop.f32.mrf.mxu1 }
 0x3ad   : > { %v2030_v17 = vadd.f32 %v2029_v31, %v1757_v51  ;;  %v2073_v12 = vadd.f32 %v2072_v62, %v1765_v44  ;;  %vm2165_vm5 = vcmp.gt.f32.partialorder %v2028_v36, 0.0  ;;  %v2181_v59 = vmul.f32 0.01, %v2028_v36 }
 0x3ae   : > { %v2031_v19 = vpop.f32.mrf.mxu0  ;;  %v2074_v7 = vpop.f32.mrf.mxu1  ;;  %v2183_v8 = vmul.f32 0.01, %v2071_v50  ;;  %vm2167_vm11 = vcmp.gt.f32.partialorder %v2071_v50, 0.0 }
 0x3af   : > { %v2032_v21 = vadd.f32 %v2031_v19, %v1753_v48  ;;  %vm2166_vm6 = vcmp.gt.f32.partialorder %v2030_v17, 0.0  ;;  %v2075_v60 = vadd.f32 %v2074_v7, %v1761_v11  ;;  %v2182_v40 = vmul.f32 0.01, %v2030_v17  ;;  %v4610_v11 = vld [vmem:[%s6353_s4 + $0x340] ss:$8 sps:$4 sm:$0xff]  }
 0x3b0   : > { %v2033_v9 = vpop.f32.mrf.mxu0  ;;  %v2076_v46 = vpop.f32.mrf.mxu1  ;;  %v2184_v20 = vmul.f32 0.01, %v2073_v12  ;;  %vm2168_vm9 = vcmp.gt.f32.partialorder %v2073_v12, 0.0  ;;  %v2197_v10 = vsel %vm2165_vm5, %v2028_v36, %v2181_v59  ;;  %v2199_v6 = vsel %vm2167_vm11, %v2071_v50, %v2183_v8  ;;  %v4616_v7 = vld [vmem:[%s6353_s4 + $0x330] ss:$8 sps:$4 sm:$0xff]  }
 0x3b1   : > { %vm2173_vm7 = vcmp.gt.f32.partialorder %v2032_v21, 0.0  ;;  %v2189_v0 = vmul.f32 0.01, %v2032_v21  ;;  %v2034_v58 = vadd.f32 %v2033_v9, %v1757_v51  ;;  %vm2175_vm8 = vcmp.gt.f32.partialorder %v2075_v60, 0.0  ;;  %v4607_v51 = vld [vmem:[%s6353_s4 + $0x240] ss:$8 sps:$4 sm:$0xff]  }
 0x3b2   : > { %v2191_v24 = vmul.f32 0.01, %v2075_v60  ;;  %v2077_v34 = vadd.f32 %v2076_v46, %v1765_v44  ;;  %v2198_v42 = vsel %vm2166_vm6, %v2030_v17, %v2182_v40  ;;  %v2200_v2 = vsel %vm2168_vm9, %v2073_v12, %v2184_v20  ;;  %v4618_v17 = vld [vmem:[%s6353_s4 + $0x334] ss:$8 sps:$4 sm:$0xff]  }
 0x3b3   : > { %vm2174_vm10 = vcmp.gt.f32.partialorder %v2034_v58, 0.0  ;;  %v2190_v14 = vmul.f32 0.01, %v2034_v58  ;;  %v2205_v5 = vsel %vm2173_vm7, %v2032_v21, %v2189_v0  ;;  %v4613_v21 = vld [vmem:[%s6353_s4 + $0x230] ss:$8 sps:$4 sm:$0xff]   ;;  %vm4822_vm9 = vmmov 0  }
 0x3b4   : > { %vm2176_vm12 = vcmp.gt.f32.partialorder %v2077_v34, 0.0  ;;  %v2192_v37 = vmul.f32 0.01, %v2077_v34  ;;  %v2207_v22 = vsel %vm2175_vm8, %v2075_v60, %v2191_v24  ;;  %v2213_v16 = vpack.c.bf16 %v2205_v5, %v2197_v10  ;;  %v4621_v60 = vld [vmem:[%s6353_s4 + $0x224] ss:$8 sps:$4 sm:$0xff]  }
 0x3b5   : > { %v2206_v45 = vsel %vm2174_vm10, %v2034_v58, %v2190_v14  ;;  %v2215_v33 = vpack.c.bf16 %v2207_v22, %v2199_v6  ;;  %v4624_v0 = vld [vmem:[%s6353_s4 + $0x324] ss:$8 sps:$4 sm:$0xff]   ;;  %v4619_v24 = vld [vmem:[%s6353_s4 + $0x220] ss:$8 sps:$4 sm:$0xff]   ;;  %v4627_v5 = vld [vmem:[%s6353_s4 + $0x214] ss:$8 sps:$4 sm:$0xff]  }
 0x3b6   : > { %v2214_v39 = vpack.c.bf16 %v2206_v45, %v2198_v42  ;;  %v2208_v63 = vsel %vm2176_vm12, %v2077_v34, %v2192_v37  ;;  %v4622_v14 = vld [vmem:[%s6353_s4 + $0x320] ss:$8 sps:$4 sm:$0xff]   ;;  %v4630_v22 = vld [vmem:[%s6353_s4 + $0x314] ss:$8 sps:$4 sm:$0xff]   ;;  %v4625_v42 = vld [vmem:[%s6353_s4 + $0x210] ss:$8 sps:$4 sm:$0xff]  }
 0x3b7   : > { %v2216_v25 = vpack.c.bf16 %v2208_v63, %v2200_v2  ;;  %v4628_v45 = vld [vmem:[%s6353_s4 + $0x310] ss:$8 sps:$4 sm:$0xff]   ;;  %v4633_v10 = vld [vmem:[%s6353_s4 + $0x204] ss:$8 sps:$4 sm:$0xff]   ;;  %v4631_v2 = vld [vmem:[%s6353_s4 + $0x200] ss:$8 sps:$4 sm:$0xff]  }
 0x3b8   : > { %3033 = vmatprep.mubr.bf16.mxu0 %v2214_v39  ;;  %v4636_v39 = vld [vmem:[%s6353_s4 + $0x304] ss:$8 sps:$4 sm:$0xff]   ;;  %v4634_v63 = vld [vmem:[%s6353_s4 + $0x300] ss:$8 sps:$4 sm:$0xff]   ;;  %v4642_v6 = vld [vmem:[%s6353_s4 + $0x3f4] ss:$8 sps:$4 sm:$0xff]  }
 0x3b9   : > { %3076 = vmatprep.mubr.bf16.mxu1 %v2216_v25  ;;  %3034 = vmatmul.mubr.bf16.vlgmr.msra.gmra.mxu0 %v2213_v16  ;;  %v4637_v16 = vld [vmem:[%s6353_s4 + $0x2f0] ss:$8 sps:$4 sm:$0xff]   ;;  %vm3409_vm12 = vcmask 523264  }
 0x3ba   : > { %3077 = vmatmul.mubr.bf16.vlgmr.msra.gmra.mxu1 %v2215_v33  ;;  %3088 = vmatpush1.bf16.msra.mxu0 %v4589_v3  ;;  %v4639_v3 = vld [vmem:[%s6353_s4 + $0x2f4] ss:$8 sps:$4 sm:$0xff]   ;;  %v4640_v25 = vld [vmem:[%s6353_s4 + $0x3f0] ss:$8 sps:$4 sm:$0xff]   ;;  %v4643_v33 = vld [vmem:[%s6353_s4 + $0x2e0] ss:$8 sps:$4 sm:$0xff]  }
 0x3bb   : > { %3131 = vmatpush1.bf16.msra.mxu1 %v4592_v23  ;;  %3089 = vmatprep.subr.bf16.mxu0 %v4597_v32  ;;  %v4645_v23 = vld [vmem:[%s6353_s4 + $0x2e4] ss:$8 sps:$4 sm:$0xff]  }
 0x3bc   : > { %3132 = vmatprep.subr.bf16.mxu1 %v4600_v13  ;;  %v4648_v32 = vld [vmem:[%s6353_s4 + $0x3e4] ss:$8 sps:$4 sm:$0xff]   ;;  %v4646_v13 = vld [vmem:[%s6353_s4 + $0x3e0] ss:$8 sps:$4 sm:$0xff]  }
 0x3be   : > { %3090 = vmatpush1.bf16.msra.mxu0 %v4595_v35  ;;  %v6014_v56 = vpop.f32.mrf.mxu0  ;;  %v6023_v1 = vpop.f32.mrf.mxu1  ;;  %v4654_v35 = vld [vmem:[%s6353_s4 + $0x3d4] ss:$8 sps:$4 sm:$0xff]  }
 0x3bf   : > { %3133 = vmatpush1.bf16.msra.mxu1 %v4598_v49  ;;  %3091 = vmatprep.subr.bf16.mxu0 %v4603_v54  ;;  %v4652_v49 = vld [vmem:[%s6353_s4 + $0x3d0] ss:$8 sps:$4 sm:$0xff]   ;;  %v4657_v54 = vld [vmem:[%s6353_s4 + $0x2c4] ss:$8 sps:$4 sm:$0xff]  }
 0x3c0   : > { %3134 = vmatprep.subr.bf16.mxu1 %v4606_v55  ;;  %v2115_v61 = vpop.f32.mrf.mxu0  ;;  %v2158_v48 = vpop.f32.mrf.mxu1  ;;  %v4660_v55 = vld [vmem:[%s6353_s4 + $0x3c4] ss:$8 sps:$4 sm:$0xff]  }
 0x3c1   : > { %v2116_v53 = vadd.f32 %v2115_v61, %v1773_v29  ;;  %v2159_v44 = vadd.f32 %v2158_v48, %v1781_v38  ;;  %v4661_v61 = vld [vmem:[%s6353_s4 + $0x2b0] ss:$8 sps:$4 sm:$0xff]   ;;  %v4669_v48 = vld [vmem:[%s6353_s4 + $0x2a4] ss:$8 sps:$4 sm:$0xff]  }
 0x3c2   : > { %3092 = vmatpush1.bf16.msra.mxu0 %v4601_v30  ;;  %v6031_v47 = vpop.f32.mrf.mxu0  ;;  %v6039_v31 = vpop.f32.mrf.mxu1  ;;  %v4658_v30 = vld [vmem:[%s6353_s4 + $0x3c0] ss:$8 sps:$4 sm:$0xff]  }
 0x3c3   : > { %3135 = vmatpush1.bf16.msra.mxu1 %v4604_v4  ;;  %3093 = vmatprep.subr.bf16.mxu0 %v4609_v57  ;;  %v2186_v36 = vmul.f32 0.01, %v2116_v53  ;;  %vm2170_vm13 = vcmp.gt.f32.partialorder %v2116_v53, 0.0  ;;  %v2188_v62 = vmul.f32 0.01, %v2159_v44  ;;  %vm2172_vm14 = vcmp.gt.f32.partialorder %v2159_v44, 0.0 }
 0x3c4   : > { %3136 = vmatprep.subr.bf16.mxu1 %v4612_v27  ;;  %v2119_v12 = vpop.f32.mrf.mxu0  ;;  %v2162_v50 = vpop.f32.mrf.mxu1  ;;  %v1768_v4 = vsub.s32 4, %v5963_v41  ;;  %v4666_v57 = vld [vmem:[%s6353_s4 + $0x3b4] ss:$8 sps:$4 sm:$0xff]   ;;  %v1776_v27 = vsub.s32 6, %v5963_v41 }
 0x3c5   : > { %v2120_v19 = vadd.f32 %v2119_v12, %v1773_v29  ;;  %v2163_v59 = vadd.f32 %v2162_v50, %v1781_v38  ;;  %v2202_v40 = vsel %vm2170_vm13, %v2116_v53, %v2186_v36  ;;  %v2204_v46 = vsel %vm2172_vm14, %v2159_v44, %v2188_v62  ;;  %v4655_v29 = vld [vmem:[%s6353_s4 + $0x2c0] ss:$8 sps:$4 sm:$0xff]   ;;  %v4663_v38 = vld [vmem:[%s6353_s4 + $0x2b4] ss:$8 sps:$4 sm:$0xff]   ;;  %v4664_v53 = vld [vmem:[%s6353_s4 + $0x3b0] ss:$8 sps:$4 sm:$0xff]  }
 0x3c6   : > { %3094 = vmatpush1.bf16.msra.mxu0 %v4607_v51  ;;  %v1769_v51 = vrot.slane %v5969_v26, %v1768_v4  ;;  %v4672_v44 = vld [vmem:[%s6353_s4 + $0x3a4] ss:$8 sps:$4 sm:$0xff]   ;;  %v4670_v36 = vld [vmem:[%s6353_s4 + $0x3a0] ss:$8 sps:$4 sm:$0xff]  }
 0x3c7   : > { %3137 = vmatpush1.bf16.msra.mxu1 %v4610_v11  ;;  %3095 = vmatprep.subr.bf16.mxu0 %v4615_v15  ;;  %vm2178_vm15 = vcmp.gt.f32.partialorder %v2120_v19, 0.0  ;;  %v2194_v9 = vmul.f32 0.01, %v2120_v19  ;;  %vm2180_vm0 = vcmp.gt.f32.partialorder %v2163_v59, 0.0  ;;  %v2196_v58 = vmul.f32 0.01, %v2163_v59 }
 0x3c8   : > { %3138 = vmatprep.subr.bf16.mxu1 %v4618_v17  ;;  %v1777_v11 = vrot.slane %v5969_v26, %v1776_v27  ;;  %v4667_v15 = vld [vmem:[%s6353_s4 + $0x2a0] ss:$8 sps:$4 sm:$0xff]   ;;  %v4675_v17 = vld [vmem:[%s6353_s4 + $0x294] ss:$8 sps:$4 sm:$0xff]   ;;  %v2114_v62 = vadd.f32 %v6014_v56, %v1769_v51  ;;  %v2118_v12 = vadd.f32 %v6031_v47, %v1769_v51  ;;  %v4676_v56 = vld [vmem:[%s6353_s4 + $0x390] ss:$8 sps:$4 sm:$0xff]  }
 0x3c9   : > { %v2210_v20 = vsel %vm2178_vm15, %v2120_v19, %v2194_v9  ;;  %v2212_v8 = vsel %vm2180_vm0, %v2163_v59, %v2196_v58  ;;  %v4678_v26 = vld [vmem:[%s6353_s4 + $0x394] ss:$8 sps:$4 sm:$0xff]   ;;  %v4681_v47 = vld [vmem:[%s6353_s4 + $0x284] ss:$8 sps:$4 sm:$0xff]   ;;  %v4679_v9 = vld [vmem:[%s6353_s4 + $0x280] ss:$8 sps:$4 sm:$0xff]  }
 0x3ca   : > { %3096 = vmatpush1.bf16.msra.mxu0 %v4613_v21  ;;  %v2218_v34 = vpack.c.bf16 %v2210_v20, %v2202_v40  ;;  %v2220_v37 = vpack.c.bf16 %v2212_v8, %v2204_v46  ;;  %v2157_v19 = vadd.f32 %v6023_v1, %v1777_v11  ;;  %v2161_v50 = vadd.f32 %v6039_v31, %v1777_v11  ;;  %v4673_v21 = vld [vmem:[%s6353_s4 + $0x290] ss:$8 sps:$4 sm:$0xff]   ;;  %v4684_v1 = vld [vmem:[%s6353_s4 + $0x384] ss:$8 sps:$4 sm:$0xff]   ;;  %v4682_v40 = vld [vmem:[%s6353_s4 + $0x380] ss:$8 sps:$4 sm:$0xff]  }
 0x3cb   : > { %3139 = vmatpush1.bf16.msra.mxu1 %v4616_v7  ;;  %3097 = vmatprep.subr.bf16.mxu0 %v4621_v60  ;;  %v2185_v7 = vmul.f32 0.01, %v2114_v62  ;;  %v2193_v59 = vmul.f32 0.01, %v2118_v12  ;;  %vm2169_vm1 = vcmp.gt.f32.partialorder %v2114_v62, 0.0  ;;  %vm2177_vm2 = vcmp.gt.f32.partialorder %v2118_v12, 0.0 }
 0x3cc   : > { %3140 = vmatprep.subr.bf16.mxu1 %v4624_v0  ;;  %3119 = vmatprep.mubr.bf16.mxu0 %v2218_v34  ;;  %v2187_v31 = vmul.f32 0.01, %v2157_v19  ;;  %v2195_v60 = vmul.f32 0.01, %v2161_v50  ;;  %vm2171_vm3 = vcmp.gt.f32.partialorder %v2157_v19, 0.0  ;;  %vm2179_vm4 = vcmp.gt.f32.partialorder %v2161_v50, 0.0 }
 0x3cd   : > { %3162 = vmatprep.mubr.bf16.mxu1 %v2220_v37  ;;  %v2201_v0 = vsel %vm2169_vm1, %v2114_v62, %v2185_v7  ;;  %v2209_v58 = vsel %vm2177_vm2, %v2118_v12, %v2193_v59  ;;  %v4685_v8 = vld [vmem:[%s6355_s6 + $0x78] sm:$0xff]   ;;  %v4688_v37 = vld [vmem:[%s6355_s6 + $0x30] sm:$0xff]   ;;  %vm3476_vm15 = vcmask 130048   ;;  %vm3540_vm0 = vcmask 1041408  }
 0x3ce   : > { %3098 = vmatpush1.bf16.msra.mxu0 %v4619_v24  ;;  %v2203_v46 = vsel %vm2171_vm3, %v2157_v19, %v2187_v31  ;;  %v2211_v20 = vsel %vm2179_vm4, %v2161_v50, %v2195_v60  ;;  %v2217_v24 = vpack.c.bf16 %v2209_v58, %v2201_v0  ;;  %vm3536_vm3 = vcmask 31744  }
 0x3cf   : > { %3141 = vmatpush1.bf16.msra.mxu1 %v4622_v14  ;;  %3099 = vmatprep.subr.bf16.mxu0 %v4627_v5  ;;  %v2219_v34 = vpack.c.bf16 %v2211_v20, %v2203_v46  ;;  %v4686_v14 = vld [vmem:[%s6355_s6 + $0x38] sm:$0xff]   ;;  %v4687_v5 = vld [vmem:[%s6355_s6 + $0x70] sm:$0xff]  }
 0x3d0   : > { %3142 = vmatprep.subr.bf16.mxu1 %v4630_v22  ;;  %v4689_v22 = vld [vmem:[%s6355_s6 + $0x68] sm:$0xff]   ;;  %v4701_v20 = vld [vmem:[%s6357_s8 + $0x18] sm:$0xff]  }
 0x3d2   : > { %3100 = vmatpush1.bf16.msra.mxu0 %v4625_v42  ;;  %v4690_v42 = vld [vmem:[%s6355_s6 + $0x28] sm:$0xff]  }
 0x3d3   : > { %3143 = vmatpush1.bf16.msra.mxu1 %v4628_v45  ;;  %3101 = vmatprep.subr.bf16.mxu0 %v4633_v10  ;;  %v4691_v45 = vld [vmem:[%s6355_s6 + $0x60] sm:$0xff]  }
 0x3d4   : > { %3144 = vmatprep.subr.bf16.mxu1 %v4636_v39  ;;  %v4692_v10 = vld [vmem:[%s6355_s6 + $0x20] sm:$0xff]   ;;  %v4693_v39 = vld [vmem:[%s6355_s6 + $0x58] sm:$0xff]  }
 0x3d6   : > { %3102 = vmatpush1.bf16.msra.mxu0 %v4631_v2  ;;  %v4694_v2 = vld [vmem:[%s6355_s6 + $0x18] sm:$0xff]  }
 0x3d7   : > { %3145 = vmatpush1.bf16.msra.mxu1 %v4634_v63  ;;  %3103 = vmatprep.subr.bf16.mxu0 %v4639_v3  ;;  %v4695_v63 = vld [vmem:[%s6355_s6 + $0x50] sm:$0xff]  }
 0x3d8   : > { %3146 = vmatprep.subr.bf16.mxu1 %v4642_v6  ;;  %v4696_v3 = vld [vmem:[%s6355_s6 + $0x10] sm:$0xff]   ;;  %v4697_v6 = vld [vmem:[%s6355_s6 + $0x48] sm:$0xff]  }
 0x3da   : > { %3104 = vmatpush2.bf16.msra.mxu0 %v4637_v16  ;;  %v4698_v16 = vld [vmem:[%s6355_s6 + $0x8] sm:$0xff]  }
 0x3db   : > { %3147 = vmatpush2.bf16.msra.mxu1 %v4640_v25  ;;  %3105 = vmatprep.subr.bf16.mxu0 %v4645_v23  ;;  %v4699_v25 = vld [vmem:[%s6355_s6 + $0x40] sm:$0xff]  }
 0x3dc   : > { %3148 = vmatprep.subr.bf16.mxu1 %v4648_v32  ;;  %v4700_v23 = vld [vmem:[%s6355_s6] sm:$0xff]  }
 0x3de   : > { %3106 = vmatpush2.bf16.msra.mxu0 %v4643_v33 }
 0x3df   : > { %3149 = vmatpush2.bf16.msra.mxu1 %v4646_v13  ;;  %3107 = vmatprep.subr.bf16.mxu0 %v4651_v52  ;;  %v2349_v13 = vld [vmem:[%s6354_s5] sm:$0x3] }
 0x3e0   : > { %3150 = vmatprep.subr.bf16.mxu1 %v4654_v35 }
 0x3e2   : > { %3108 = vmatpush2.bf16.msra.mxu0 %v4649_v18  ;;  %v2354_v18 = vrot.slane %v2349_v13, %v1752_v28 }
 0x3e3   : > { %3151 = vmatpush2.bf16.msra.mxu1 %v4652_v49  ;;  %3109 = vmatprep.subr.bf16.mxu0 %v4657_v54  ;;  %v2358_v49 = vrot.slane %v2349_v13, %v1756_v43 }
 0x3e4   : > { %3152 = vmatprep.subr.bf16.mxu1 %v4660_v55 }
 0x3e6   : > { %3110 = vmatpush2.bf16.msra.mxu0 %v4655_v29 }
 0x3e7   : > { %3153 = vmatpush2.bf16.msra.mxu1 %v4658_v30  ;;  %3111 = vmatprep.subr.bf16.mxu0 %v4663_v38 }
 0x3e8   : > { %3154 = vmatprep.subr.bf16.mxu1 %v4666_v57 }
 0x3ea   : > { %3112 = vmatpush2.bf16.msra.mxu0 %v4661_v61 }
 0x3eb   : > { %3155 = vmatpush2.bf16.msra.mxu1 %v4664_v53  ;;  %3113 = vmatprep.subr.bf16.mxu0 %v4669_v48 }
 0x3ec   : > { %3156 = vmatprep.subr.bf16.mxu1 %v4672_v44 }
 0x3ee   : > { %3114 = vmatpush2.bf16.msra.mxu0 %v4667_v15 }
 0x3ef   : > { %3157 = vmatpush2.bf16.msra.mxu1 %v4670_v36  ;;  %3115 = vmatprep.subr.bf16.mxu0 %v4675_v17 }
 0x3f0   : > { %3158 = vmatprep.subr.bf16.mxu1 %v4678_v26 }
 0x3f2   : > { %3116 = vmatpush2.bf16.msra.mxu0 %v4673_v21 }
 0x3f3   : > { %3159 = vmatpush2.bf16.msra.mxu1 %v4676_v56  ;;  %3117 = vmatprep.subr.bf16.mxu0 %v4681_v47 }
 0x3f4   : > { %3160 = vmatprep.subr.bf16.mxu1 %v4684_v1 }
 0x3f6   : > { %3118 = vmatpush2.bf16.msra.mxu0 %v4679_v9 }
 0x3f7   : > { %3161 = vmatpush2.bf16.msra.mxu1 %v4682_v40  ;;  %4109 = vmatprep.subr.bf16.mxu0 %v4685_v8  ;;  %v4703_v8 = vld [vmem:[%s6357_s8 + $0x8] sm:$0xff]  }
 0x3f9   : > { %3120 = vmatmul.mubr.bf16.vlgmr.msra.gmra.mxu0 %v2217_v24  ;;  %v4821_v24 = vmov 0.0  }
 0x3fa   : > { %3163 = vmatmul.mubr.bf16.vlgmr.msra.gmra.mxu1 %v2219_v34  ;;  %4110 = vmatpush3.bf16.msra.mxu0 %v4686_v14  ;;  %v4702_v34 = vld [vmem:[%s6357_s8 + $0x10] sm:$0xff]   ;;  %v4704_v14 = vld [vmem:[%s6357_s8] sm:$0xff]  }
 0x3fb   : > { %4111 = vmatprep.subr.bf16.mxu0 %v4687_v5  ;;  %4140 = vmatprep.subr.bf16.mxu1 %v4821_v24 }
 0x3fc   : > { %4141 = vmatpush3.bf16.msra.mxu1 %v4701_v20  ;;  %4148 = vmatprep.mubr.msk.bf16.mxu1 %vm4822_vm9, %v4821_v24 }
 0x3fd   : > { %4142 = vmatprep.subr.bf16.mxu1 %v4821_v24 }
 0x3fe   : > { %4112 = vmatpush3.bf16.msra.mxu0 %v4688_v37  ;;  %v3965_v37 = vld [vmem:[%s6356_s7] ss:$0 sm:$0xff] }
 0x3ff   : > { %4113 = vmatprep.subr.bf16.mxu0 %v4689_v22 }
 0x400   : > { %4143 = vmatpush3.bf16.msra.mxu1 %v4702_v34 }
 0x401   : > { %4144 = vmatprep.subr.bf16.mxu1 %v4821_v24 }
 0x402   : > { %4114 = vmatpush3.bf16.msra.mxu0 %v4690_v42 }
 0x403   : > { %4115 = vmatprep.subr.bf16.mxu0 %v4691_v45 }
 0x404   : > { %4145 = vmatpush3.bf16.msra.mxu1 %v4703_v8 }
 0x405   : > { %4146 = vmatprep.subr.bf16.mxu1 %v4821_v24 }
 0x406   : > { %4116 = vmatpush3.bf16.msra.mxu0 %v4692_v10 }
 0x407   : > { %4117 = vmatprep.subr.bf16.mxu0 %v4693_v39 }
 0x408   : > { %4147 = vmatpush3.bf16.msra.mxu1 %v4704_v14 }
 0x409   : > { %4152 = vmatprep.subr.bf16.mxu1 %v4821_v24 }
 0x40a   : > { %4118 = vmatpush3.bf16.msra.mxu0 %v4694_v2 }
 0x40b   : > { %4119 = vmatprep.subr.bf16.mxu0 %v4695_v63 }
 0x40e   : > { %4120 = vmatpush3.bf16.msra.mxu0 %v4696_v3 }
 0x40f   : > { %4121 = vmatprep.subr.bf16.mxu0 %v4697_v6 }
 0x412   : > { %4122 = vmatpush3.bf16.msra.mxu0 %v4698_v16 }
 0x413   : > { %4123 = vmatprep.subr.bf16.mxu0 %v4699_v25 }
 0x416   : > { %4124 = vmatpush3.bf16.msra.mxu0 %v4700_v23 }
 0x479   : > { %v3035_v32 = vpop.f32.mrf.mxu0 }
 0x47a   : > { %v3078_v33 = vpop.f32.mrf.mxu1  ;;  %v3036_v29 = vadd.f32 %v3035_v32, %v2354_v18  ;;  %v4705_v32 = vld [vmem:[%s6359_s10] sm:$0xff]  }
 0x47b   : > { %v3037_v52 = vpop.f32.mrf.mxu0 }
 0x47c   : > { %v3080_v35 = vpop.f32.mrf.mxu1  ;;  %v3038_v30 = vadd.f32 %v3037_v52, %v2358_v49  ;;  %v3079_v61 = vadd.f32 %v3078_v33, %v3036_v29  ;;  %v3982_v33 = vld [vmem:[%s6384_s11] ss:$0 sm:$0xff] }
 0x47d   : > { %v3039_v54 = vpop.f32.mrf.mxu0 }
 0x47e   : > { %v3082_v55 = vpop.f32.mrf.mxu1  ;;  %v3040_v4 = vadd.f32 %v3039_v54, %v2354_v18  ;;  %v3081_v53 = vadd.f32 %v3080_v35, %v3038_v30 }
 0x47f   : > { %v3041_v38 = vpop.f32.mrf.mxu0 }
 0x480   : > { %v3084_v57 = vpop.f32.mrf.mxu1  ;;  %v3042_v51 = vadd.f32 %v3041_v38, %v2358_v49  ;;  %v3083_v11 = vadd.f32 %v3082_v55, %v3040_v4 }
 0x482   : > { %v3085_v62 = vadd.f32 %v3084_v57, %v3042_v51  ;;  %v3528_v57 = vld [vmem:[%s6385_s19] sm:$0x3] }
 0x4b9   : > { %v3121_v27 = vpop.f32.mrf.mxu0 }
 0x4ba   : > { %v3164_v48 = vpop.f32.mrf.mxu1  ;;  %v3122_v15 = vadd.f32 %v3121_v27, %v3079_v61  ;;  %v3542_v27 = vsel %vm3540_vm0, %v3528_v57, 0  ;;  %v3988_v61 = vld [vmem:[%s6386_s16] ss:$0 sm:$0xff] }
 0x4bb   : > { %v3123_v44 = vpop.f32.mrf.mxu0 }
 0x4bc   : > { %v3124_v36 = vadd.f32 %v3123_v44, %v3081_v53  ;;  %v3166_v28 = vpop.f32.mrf.mxu1  ;;  %v3165_v19 = vadd.f32 %v3164_v48, %v3122_v15 }
 0x4bd   : > { %v3125_v17 = vpop.f32.mrf.mxu0 }
 0x4be   : > { %v3126_v41 = vadd.f32 %v3125_v17, %v3083_v11  ;;  %v3168_v43 = vpop.f32.mrf.mxu1  ;;  %v3167_v12 = vadd.f32 %v3166_v28, %v3124_v36  ;;  %v3177_v1 = vmul.f32 0.01, %v3165_v19  ;;  %vm3173_vm7 = vcmp.gt.f32.partialorder %v3165_v19, 0.0 }
 0x4bf   : > { %v3127_v26 = vpop.f32.mrf.mxu0 }
 0x4c0   : > { %v3169_v50 = vadd.f32 %v3168_v43, %v3126_v41  ;;  %v3128_v21 = vadd.f32 %v3127_v26, %v3085_v62  ;;  %v3170_v47 = vpop.f32.mrf.mxu1  ;;  %v3178_v7 = vmul.f32 0.01, %v3167_v12  ;;  %vm3174_vm6 = vcmp.gt.f32.partialorder %v3167_v12, 0.0  ;;  %v3991_v62 = vld [vmem:[%s6387_s26] ss:$0 sm:$0xff] }
 0x4c1   : > { %v3181_v0 = vsel %vm3173_vm7, %v3165_v19, %v3177_v1 }
 0x4c2   : > { %v3179_v56 = vmul.f32 0.01, %v3169_v50  ;;  %vm3175_vm5 = vcmp.gt.f32.partialorder %v3169_v50, 0.0  ;;  %v3171_v59 = vadd.f32 %v3170_v47, %v3128_v21  ;;  %v3182_v9 = vsel %vm3174_vm6, %v3167_v12, %v3178_v7 }
 0x4c4   : > { %vm3176_vm8 = vcmp.gt.f32.partialorder %v3171_v59, 0.0  ;;  %v3180_v31 = vmul.f32 0.01, %v3171_v59  ;;  %v3183_v60 = vsel %vm3175_vm5, %v3169_v50, %v3179_v56 }
 0x4c5   : > { %v3185_v46 = vpack.c.bf16 %v3183_v60, %v3181_v0 }
 0x4c6   : > { %v3184_v40 = vsel %vm3176_vm8, %v3171_v59, %v3180_v31 }
 0x4c7   : > { %v3186_v58 = vpack.c.bf16 %v3184_v40, %v3182_v9 }
 0x4c9   : > { %3354 = vmatprep.mubr.bf16.mxu0 %v3186_v58 }
 0x4ca   : > { %3355 = vmatmul.mubr.bf16.vlgmr.msra.gmra.mxu0 %v3185_v46 }
 0x58a   : > { %v4125_v5 = vpop.f32.mrf.mxu0 }
 0x58c   : > { %v4126_v22 = vpop.f32.mrf.mxu0 }
 0x58d   : > { %v4127_v42 = vadd.f32 %v4126_v22, %v4125_v5 }
 0x58e   : > { %v4128_v45 = vpop.f32.mrf.mxu0 }
 0x58f   : > { %v3357_v10 = vadd.f32 %v4127_v42, %v3965_v37 }
 0x590   : > { %v4129_v39 = vpop.f32.mrf.mxu0 }
 0x591   : > { %v4130_v2 = vadd.f32 %v4129_v39, %v4128_v45  ;;  %v3365_v63 = vmul.f32 0.01, %v3357_v10  ;;  %vm3363_vm10 = vcmp.gt.f32.partialorder %v3357_v10, 0.0 }
 0x593   : > { %v3360_v3 = vadd.f32 %v4130_v2, %v3965_v37  ;;  %v3367_v16 = vsel %vm3363_vm10, %v3357_v10, %v3365_v63 }
 0x595   : > { %vm3364_vm11 = vcmp.gt.f32.partialorder %v3360_v3, 0.0  ;;  %v3366_v6 = vmul.f32 0.01, %v3360_v3 }
 0x597   : > { %v3368_v25 = vsel %vm3364_vm11, %v3360_v3, %v3366_v6 }
 0x598   : > { %v3369_v23 = vpack.c.bf16 %v3368_v25, %v3367_v16 }
 0x59a   : > { %4149 = vmatmul.mubr.msk.bf16.vlgmr.msra.gmra.mxu1 %vm3409_vm12, %v3369_v23 }
 0x59b   : > { %4154 = vmatprep.mubr.msk.bf16.mxu1 %vm4822_vm9, %v4821_v24  ;;  %4153 = vmatpush3.bf16.msra.mxu1 %v4705_v32 }
 0x59c   : > { %4158 = vmatprep.subr.bf16.mxu1 %v4821_v24 }
 0x65a   : > { %v3447_v13 = vpop.f32.mrf.mxu1 }
 0x65b   : > { %v3448_v52 = vadd.f32 %v3982_v33, %v3447_v13 }
 0x65c   : > { %v4150_v35 = vpop.f32.mrf.mxu1 }
 0x65d   : > { %v3456_v49 = vmul.f32 0.01, %v3448_v52  ;;  %vm3454_vm13 = vcmp.gt.f32.partialorder %v3448_v52, 0.0 }
 0x65e   : > { %v3450_v18 = vpop.f32.mrf.mxu1 }
 0x65f   : > { %v3451_v54 = vadd.f32 %v3982_v33, %v3450_v18  ;;  %v3458_v30 = vsel %vm3454_vm13, %v3448_v52, %v3456_v49 }
 0x660   : > { %v4151_v55 = vpop.f32.mrf.mxu1 }
 0x661   : > { %vm3455_vm14 = vcmp.gt.f32.partialorder %v3451_v54, 0.0  ;;  %v3457_v29 = vmul.f32 0.01, %v3451_v54 }
 0x663   : > { %v3459_v38 = vsel %vm3455_vm14, %v3451_v54, %v3457_v29 }
 0x664   : > { %v3460_v4 = vpack.c.bf16 %v3459_v38, %v3458_v30 }
 0x666   : > { %4155 = vmatmul.mubr.msk.bf16.vlgmr.msra.gmra.mxu1 %vm3476_vm15, %v3460_v4 }
 0x667   : > { %4160 = vmatprep.mubr.msk.bf16.mxu1 %vm4822_vm9, %v4821_v24  ;;  %4159 = vmatpush3.bf16.msra.mxu1 %v3542_v27 }
 0x726   : > { %v3514_v53 = vpop.f32.mrf.mxu1 }
 0x727   : > { %v3515_v48 = vadd.f32 %v3988_v61, %v3514_v53 }
 0x728   : > { %v4156_v51 = vpop.f32.mrf.mxu1 }
 0x729   : > { %v3523_v11 = vmul.f32 0.01, %v3515_v48  ;;  %vm3521_vm1 = vcmp.gt.f32.partialorder %v3515_v48, 0.0 }
 0x72a   : > { %v3517_v44 = vpop.f32.mrf.mxu1 }
 0x72b   : > { %v3518_v15 = vadd.f32 %v3988_v61, %v3517_v44  ;;  %v3525_v17 = vsel %vm3521_vm1, %v3515_v48, %v3523_v11 }
 0x72c   : > { %v4157_v36 = vpop.f32.mrf.mxu1 }
 0x72d   : > { %vm3522_vm2 = vcmp.gt.f32.partialorder %v3518_v15, 0.0  ;;  %v3524_v28 = vmul.f32 0.01, %v3518_v15 }
 0x72f   : > { %v3526_v41 = vsel %vm3522_vm2, %v3518_v15, %v3524_v28 }
 0x730   : > { %v3527_v43 = vpack.c.bf16 %v3526_v41, %v3525_v17 }
 0x732   : > { %4161 = vmatmul.mubr.msk.bf16.vlgmr.msra.gmra.mxu1 %vm3536_vm3, %v3527_v43 }
 0x7f2   : > { %v3578_v12 = vpop.f32.mrf.mxu1 }
 0x7f3   : > { %v3579_v26 = vadd.f32 %v3991_v62, %v3578_v12 }
 0x7f4   : > { %v4162_v19 = vpop.f32.mrf.mxu1 }
 0x7f5   : > { %vm3585_vm4 = vcmp.gt.f32.partialorder %v3579_v26, 0.0  ;;  %v3587_v50 = vmul.f32 0.01, %v3579_v26 }
 0x7f6   : > { %v3581_v21 = vpop.f32.mrf.mxu1 }
 0x7f7   : > { %v3589_v56 = vsel %vm3585_vm4, %v3579_v26, %v3587_v50  ;;  %v3582_v47 = vadd.f32 %v3991_v62, %v3581_v21 }
 0x7f8   : > { %3591 = vst [vmem:[%s5058_s0] sm:$0xff] %v3589_v56  ;;  %v4163_v7 = vpop.f32.mrf.mxu1 }
 0x7f9   : > { %vm3586_vm5 = vcmp.gt.f32.partialorder %v3582_v47, 0.0  ;;  %v3588_v59 = vmul.f32 0.01, %v3582_v47 }
 0x7fb   : > { %v3590_v1 = vsel %vm3586_vm5, %v3582_v47, %v3588_v59 }
 0x7fc   : > { %3592 = vst [vmem:[%s5058_s0 + $0x8] sm:$0xff] %v3590_v1 }
 0x7fd PF: > { %s6388_s24 = sld [smem:[#allocation8_spill]]  ;;  %s3607_s16 = sshll.u32 %s5058_s0, 4  ;;  %s6288_s16 = int_to_ptr.vmem [resolvable:$true] %s3607_s16 }
 0x7fe   : > { %s6389_s19 = sld [smem:[#allocation17_spill]]  ;;  %s6292_s18 = scalar_lea.sflag [#allocation5], %s554_s29 }
 0x7ff   : > { %s4706_s12 = scalar_lea.vmem %s6288_s16, 256  ;;  %s4823_s26 = smov [#allocation4]  }
 0x800   : > { %p4707_p6 = scmp.ne.s32.totalorder %s6288_s16, %s4706_s12 }
 0x802   : > { %p4708_p8 = pnand %p4707_p6, %p4973_p7 }
 0x803   : > { %s3998_s11 = sshll.u32 %s6388_s24, 8  ;;  %s4710_s24 = sshll.u32 %s4823_s26, 4  ;;  %s4711_s24 = int_to_ptr.vmem [resolvable:$false] %s4710_s24 }
 0x804   : > { %s6390_s27 = smov %s6389_s19  ;;  %s6285_s14 = scalar_lea.hbm %s6389_s19, %s3998_s11 }
 0x805   : > { %p4709_p9 = pneg %p4708_p8  ;;  %s4712_s25 = scalar_lea.vmem %s4711_s24, 512 }
 0x806   : > { %p4713_p10 = scmp.lt.s32.totalorder %s6288_s16, %s4711_s24  ;;  %p4714_p11 = scmp.lt.s32.totalorder %s4712_s25, %s4706_s12 }
 0x808   : > { %p4715_p13 = por %p4714_p11, %p4713_p10 }
 0x80a   : > { %p4716_p0 = pnand %p4715_p13, %p4709_p9 }
 0x80c   : > { %4719 = shalt.err (!%p4716_p0)
}
 0x80d   : > { %s4720_s0 = scalar_lea.hbm %s6285_s14, 256  ;;  %s4724_s28 = scalar_lea.hbm %s6390_s27, 512 }
 0x80e   : > { %p4721_p1 = scmp.ne.s32.totalorder %s6285_s14, %s4720_s0  ;;  %p4725_p4 = scmp.lt.s32.totalorder %s6285_s14, %s6390_s27 }
 0x80f   : > { %p4726_p5 = scmp.lt.s32.totalorder %s4724_s28, %s4720_s0 }
 0x810   : > { %p4722_p2 = pnand %p4721_p1, %p4973_p7 }
 0x811   : > { %p4727_p6 = por %p4726_p5, %p4725_p4 }
 0x812   : > { %p4723_p3 = pneg %p4722_p2 }
 0x814   : > { %p4728_p8 = pnand %p4727_p6, %p4723_p3 }
 0x816   : > { %4731 = shalt.err (!%p4728_p8)
}
 0x817   : > { %s4824_s12 = smov 128   ;;  %s4825_s24 = smov 8  }
 0x818   : > { %4167 = dma.vmem_to_hbm [thread:$0]  (%p4973_p7), %s6288_s16, 256, %s6285_s14, %s6292_s18, %s4824_s12, %s4824_s12, %s4825_s24  }
 0x819 PF: > { %s6391_s25 = sld [smem:[#allocation7_spill]]  ;;  %p4173_p9 = scmp.ge.s32.totalorder %s4814_s22, 2 }
 0x81b   : > { %p4170_p10 = pnand %p4173_p9, %p4981_p12 }
 0x81d   : > { %p4171_p11 = pneg %p4170_p10 }
 0x81f   : > { %s3622_s11 = sand.u32 1, %s6391_s25  }
 0x820   : > { %s3623_s0 = scalar_lea.sflag [#allocation5], %s3622_s11 }
 0x821   : > { %4773 = dma.done.wait (%p4171_p11), %s3623_s0, 256  }
 0x822   : > { %4775 = vsyncadd (%p4171_p11), %s3623_s0, 4294967040  ;;  %s27_s22 = sadd.s32 1, %s4814_s22   ;;  %s6393_s13 = sld [smem:[#allocation9_spill]] }
 0x823   : > { %p24_p13 = scmp.ge.s32.totalorder %s27_s22, 10   ;;  %s6394_s14 = sld [smem:[#allocation10_spill]] }
 0x824   : > { %s6395_s29 = smov %s4782_s30  ;;  %s6396_s30 = smov %s4786_s15 }
 0x825   : > { %s6397_s15 = smov %s4986_s9  ;;  %s6398_s16 = smov %s4794_s17 }
 0x826   : > { %s6399_s17 = smov %s4989_s23  ;;  %s6400_s18 = smov %s4806_s20 }
 0x827   : > { %s6401_s19 = smov %s4810_s21  ;;  %26 = sbr.rel (!%p24_p13) target bundleno = 13 (0xd), region = 150 }
 0x828   : > { %s6402_s20 = smov %s6393_s13 }
 0x829   : > { %s6403_s21 = smov %s6394_s14 }
 0x82c   :  { %3628 = vsyncpa [#allocation5], 1 }
 0x82d   :  { %3630 = vsyncpa [#allocation5 + $0x1], 1 }

</bundles_post_ra>
